<compile_context>
chip_gen: v7x
topology: tpu7x:2x2x1
jax: 0.10.0
libtpu: 0.0.40
codegen_flags: <defaults>
</compile_context>

<pallas_src>
import math

import jax
import jax.numpy as jnp
from jax.experimental import pallas as pl
from jax.experimental.pallas import tpu as pltpu


# ------------------------------- model config -------------------------------

VOCAB = 100
MAX_POS = 64
TYPE_VOCAB = 2
HIDDEN = 32
N_HEADS = 2
HEAD_DIM = HIDDEN // N_HEADS
INTERMEDIATE = 64
N_LAYERS = 2
N_CLASSES = 3
LN_EPS = 1e-12

# weight-input order shared by the pallas_call args and the kernel signature
_WEIGHT_ORDER = (
    "emb_ln_g", "emb_ln_b",
    "wqkv", "bqkv", "wo", "bo", "ln1_g", "ln1_b",
    "w1", "b1", "w2", "b2", "ln2_g", "ln2_b",
    "pool_w", "pool_b", "cls_w", "cls_b",
)


# ----------------------------- fused model kernel ----------------------------

def _gelu_tanh(x):
    # tanh-approx GELU ("gelu_new"); only Python-float literals -> no captured consts.
    return 0.5 * x * (1.0 + jnp.tanh(0.7978845608028654 *
                                     (x + 0.044715 * x * x * x)))


def _layernorm(v, g, b):
    mu = jnp.mean(v, axis=-1, keepdims=True)
    var = jnp.mean((v - mu) * (v - mu), axis=-1, keepdims=True)
    return (v - mu) * jax.lax.rsqrt(var + LN_EPS) * g + b


def _bert_asc_kernel(
    emb_ref,                      # (1, S, H)  word+pos+type embedding sum (this sample)
    mask_ref,                     # (1, 1, S)  additive key mask: 0 keep / -1e4 drop
    emb_ln_g, emb_ln_b,           # (1, H)
    wqkv, bqkv,                   # (L, H, 3H), (L, 1, 3H)   (Q part pre-scaled)
    wo, bo,                       # (L, H, H), (L, 1, H)
    ln1_g, ln1_b,                 # (L, 1, H)
    w1, b1,                       # (L, H, I), (L, 1, I)
    w2, b2,                       # (L, I, H), (L, 1, H)
    ln2_g, ln2_b,                 # (L, 1, H)
    pool_w, pool_b,               # (H, H), (1, H)
    cls_w, cls_b,                 # (H, C), (1, C)
    out_ref,                      # (1, 1, C)
):
    x = emb_ref[0]                # (S, H)
    mask_add = mask_ref[0]        # (1, S) -> broadcasts over query rows

    # embedding LayerNorm
    x = _layernorm(x, emb_ln_g[...], emb_ln_b[...])

    # encoder layers (statically unrolled; weights stay resident in VMEM)
    for l in range(N_LAYERS):
        last = (l == N_LAYERS - 1)

        # fused QKV projection; 1/sqrt(head_dim) already folded into Q weights
        qkv = jnp.dot(x, wqkv[l], preferred_element_type=jnp.float32) + bqkv[l]
        wo_l = wo[l]

        # Only the [CLS] row of the final layer feeds the pooler, so on the
        # last layer restrict queries / residual / FFN to row 0 (K, V still
        # span the full sequence).
        q_rows = qkv[0:1, :] if last else qkv     # (Sq, 3H)
        x_res = x[0:1, :] if last else x          # (Sq, H)

        attn = None
        for h in range(N_HEADS):
            lo = h * HEAD_DIM
            q = q_rows[:, lo:lo + HEAD_DIM]                            # (Sq, DH)
            k = qkv[:, HIDDEN + lo:HIDDEN + lo + HEAD_DIM]             # (S, DH)
            v = qkv[:, 2 * HIDDEN + lo:2 * HIDDEN + lo + HEAD_DIM]     # (S, DH)

            # scores = q @ k^T  (NT contraction, no explicit transpose)
            s = jax.lax.dot_general(q, k, (((1,), (1,)), ((), ())),
                                    preferred_element_type=jnp.float32)  # (Sq, S)
            s = s + mask_add
            s = s - jnp.max(s, axis=-1, keepdims=True)
            p = jnp.exp(s)
            p = p * pl.reciprocal(jnp.sum(p, axis=-1, keepdims=True), approx=True)
            ctx = jnp.dot(p, v, preferred_element_type=jnp.float32)      # (Sq, DH)

            # fold head context straight into the output projection rows
            contrib = jnp.dot(ctx, wo_l[lo:lo + HEAD_DIM, :],
                              preferred_element_type=jnp.float32)        # (Sq, H)
            attn = contrib if attn is None else attn + contrib

        xq = _layernorm(x_res + attn + bo[l], ln1_g[l], ln1_b[l])         # (Sq, H)

        ff = jnp.dot(xq, w1[l], preferred_element_type=jnp.float32) + b1[l]
        ff = _gelu_tanh(ff)
        ff = jnp.dot(ff, w2[l], preferred_element_type=jnp.float32) + b2[l]
        x = _layernorm(xq + ff, ln2_g[l], ln2_b[l])                       # (Sq, H)

    # pooler (tanh dense on [CLS] token) -> dropout(identity) -> classifier+softmax
    cls_tok = x[0:1, :]                                                    # (1, H)
    pooled = jnp.tanh(jnp.dot(cls_tok, pool_w[...],
                              preferred_element_type=jnp.float32) + pool_b[...])
    logits = jnp.dot(pooled, cls_w[...],
                     preferred_element_type=jnp.float32) + cls_b[...]      # (1, C)
    logits = logits - jnp.max(logits, axis=-1, keepdims=True)
    e = jnp.exp(logits)
    out_ref[0] = e / jnp.sum(e, axis=-1, keepdims=True)                    # exact softmax


# ----------------------------- pallas_call wrapper ----------------------------

def _bert_asc_pallas(packed, emb, mask_add):
    B, S, H = emb.shape
    C = packed["cls_w"].shape[1]
    weights = [packed[k] for k in _WEIGHT_ORDER]

    def full_spec(w):
        # whole-array block, same block index every grid step (stays resident)
        return pl.BlockSpec(w.shape, lambda b, nd=w.ndim: (0,) * nd)

    out = pl.pallas_call(
        _bert_asc_kernel,
        out_shape=jax.ShapeDtypeStruct((B, 1, C), jnp.float32),
        grid=(B,),
        in_specs=[pl.BlockSpec((1, S, H), lambda b: (b, 0, 0)),
                  pl.BlockSpec((1, 1, S), lambda b: (b, 0, 0))]
                 + [full_spec(w) for w in weights],
        out_specs=pl.BlockSpec((1, 1, C), lambda b: (b, 0, 0)),
        compiler_params=pltpu.CompilerParams(
            dimension_semantics=("parallel",)),   # batch across 2 TCs on v7x
    )(emb, mask_add, *weights)
    return out.reshape(B, C)


# ------------------------------ params & packing ------------------------------

def init_params(key):
    def nrm(k, shape, scale=0.02):
        return (jax.random.normal(k, shape, jnp.float32) * scale).astype(jnp.float32)

    keys = iter(jax.random.split(key, 8 + N_LAYERS * 8))
    params = {
        "word_emb": nrm(next(keys), (VOCAB, HIDDEN)),
        "pos_emb": nrm(next(keys), (MAX_POS, HIDDEN)),
        "type_emb": nrm(next(keys), (TYPE_VOCAB, HIDDEN)),
        "emb_ln_g": jnp.ones((HIDDEN,), jnp.float32),
        "emb_ln_b": jnp.zeros((HIDDEN,), jnp.float32),
        "pool_w": nrm(next(keys), (HIDDEN, HIDDEN)),
        "pool_b": jnp.zeros((HIDDEN,), jnp.float32),
        "cls_w": nrm(next(keys), (HIDDEN, N_CLASSES)),
        "cls_b": jnp.zeros((N_CLASSES,), jnp.float32),
        "layers": [],
    }
    for _ in range(N_LAYERS):
        params["layers"].append({
            "wq": nrm(next(keys), (HIDDEN, HIDDEN)), "bq": jnp.zeros((HIDDEN,), jnp.float32),
            "wk": nrm(next(keys), (HIDDEN, HIDDEN)), "bk": jnp.zeros((HIDDEN,), jnp.float32),
            "wv": nrm(next(keys), (HIDDEN, HIDDEN)), "bv": jnp.zeros((HIDDEN,), jnp.float32),
            "wo": nrm(next(keys), (HIDDEN, HIDDEN)), "bo": jnp.zeros((HIDDEN,), jnp.float32),
            "ln1_g": jnp.ones((HIDDEN,), jnp.float32), "ln1_b": jnp.zeros((HIDDEN,), jnp.float32),
            "w1": nrm(next(keys), (HIDDEN, INTERMEDIATE)), "b1": jnp.zeros((INTERMEDIATE,), jnp.float32),
            "w2": nrm(next(keys), (INTERMEDIATE, HIDDEN)), "b2": jnp.zeros((HIDDEN,), jnp.float32),
            "ln2_g": jnp.ones((HIDDEN,), jnp.float32), "ln2_b": jnp.zeros((HIDDEN,), jnp.float32),
        })
    return params


def pack_params(params):
    """One-time packing: stack per-layer weights, fuse QKV, fold 1/sqrt(dh) into Q."""
    scale = 1.0 / math.sqrt(HEAD_DIM)           # Python float (no traced consts)

    def stack(fn):
        return jnp.stack([fn(l) for l in params["layers"]], axis=0)

    return {
        "word_emb": params["word_emb"],
        "pos_emb": params["pos_emb"],
        "type_emb": params["type_emb"],
        "emb_ln_g": params["emb_ln_g"].reshape(1, HIDDEN),
        "emb_ln_b": params["emb_ln_b"].reshape(1, HIDDEN),
        "wqkv": stack(lambda l: jnp.concatenate(
            [l["wq"] * scale, l["wk"], l["wv"]], axis=1)),
        "bqkv": stack(lambda l: jnp.concatenate(
            [l["bq"] * scale, l["bk"], l["bv"]])[None, :]),
        "wo": stack(lambda l: l["wo"]),
        "bo": stack(lambda l: l["bo"][None, :]),
        "ln1_g": stack(lambda l: l["ln1_g"][None, :]),
        "ln1_b": stack(lambda l: l["ln1_b"][None, :]),
        "w1": stack(lambda l: l["w1"]),
        "b1": stack(lambda l: l["b1"][None, :]),
        "w2": stack(lambda l: l["w2"]),
        "b2": stack(lambda l: l["b2"][None, :]),
        "ln2_g": stack(lambda l: l["ln2_g"][None, :]),
        "ln2_b": stack(lambda l: l["ln2_b"][None, :]),
        "pool_w": params["pool_w"],
        "pool_b": params["pool_b"].reshape(1, HIDDEN),
        "cls_w": params["cls_w"],
        "cls_b": params["cls_b"].reshape(1, N_CLASSES),
    }


# ------------------------------- forward pass ---------------------------------

@jax.jit
def bert_asc_forward(packed, input_ids, token_type_ids, attention_masks):
    B, S = input_ids.shape
    # plain-JAX glue: embedding gathers + additive-mask construction
    we = jnp.take(packed["word_emb"], input_ids, axis=0)            # (B, S, H)
    pe = packed["pos_emb"][:S][None, :, :]                          # (1, S, H)
    te = jnp.take(packed["type_emb"], token_type_ids, axis=0)       # (B, S, H)
    emb = (we + pe + te).astype(jnp.float32)                        # (B, S, H)
    mask_add = ((1.0 - attention_masks.astype(jnp.float32))
                * -10000.0)[:, None, :]                             # (B, 1, S)
    return _bert_asc_pallas(packed, emb, mask_add)                  # (B, C) probs


# ----------------------------------- main --------------------------------------

if __name__ == "__main__":
    key = jax.random.PRNGKey(0)
    pkey, dkey1, dkey2 = jax.random.split(key, 3)

    params = init_params(pkey)
    packed = pack_params(params)

    B, S = 2, 8
    input_ids = jax.random.randint(dkey1, (B, S), 0, VOCAB, dtype=jnp.int32)
    token_type_ids = jax.random.randint(dkey2, (B, S), 0, TYPE_VOCAB, dtype=jnp.int32)
    attention_masks = jnp.ones((B, S), dtype=jnp.int32).at[1, 6:].set(0)  # pad tail of seq 1

    probs = bert_asc_forward(packed, input_ids, token_type_ids, attention_masks)
    probs = jax.block_until_ready(probs)

    assert probs.shape == (B, N_CLASSES)
    assert bool(jnp.all(jnp.isfinite(probs)))
    assert bool(jnp.allclose(jnp.sum(probs, axis=1), 1.0, atol=1e-5))
    print("KERNEL_OK")
</pallas_src>

<mosaic_0001>
module attributes {stable_mosaic.version = 11 : i64} {
  func.func @_bert_asc_kernel(%arg0: i32, %arg1: memref<1x8x32xf32, #tpu.memory_space<vmem>>, %arg2: memref<1x1x8xf32, #tpu.memory_space<vmem>>, %arg3: memref<1x32xf32, #tpu.memory_space<vmem>>, %arg4: memref<1x32xf32, #tpu.memory_space<vmem>>, %arg5: memref<2x32x96xf32, #tpu.memory_space<vmem>>, %arg6: memref<2x1x96xf32, #tpu.memory_space<vmem>>, %arg7: memref<2x32x32xf32, #tpu.memory_space<vmem>>, %arg8: memref<2x1x32xf32, #tpu.memory_space<vmem>>, %arg9: memref<2x1x32xf32, #tpu.memory_space<vmem>>, %arg10: memref<2x1x32xf32, #tpu.memory_space<vmem>>, %arg11: memref<2x32x64xf32, #tpu.memory_space<vmem>>, %arg12: memref<2x1x64xf32, #tpu.memory_space<vmem>>, %arg13: memref<2x64x32xf32, #tpu.memory_space<vmem>>, %arg14: memref<2x1x32xf32, #tpu.memory_space<vmem>>, %arg15: memref<2x1x32xf32, #tpu.memory_space<vmem>>, %arg16: memref<2x1x32xf32, #tpu.memory_space<vmem>>, %arg17: memref<32x32xf32, #tpu.memory_space<vmem>>, %arg18: memref<1x32xf32, #tpu.memory_space<vmem>>, %arg19: memref<32x3xf32, #tpu.memory_space<vmem>>, %arg20: memref<1x3xf32, #tpu.memory_space<vmem>>, %arg21: memref<1x1x3xf32, #tpu.memory_space<vmem>>) attributes {dimension_semantics = [#tpu.dimension_semantics<parallel>], iteration_bounds = array<i64: 2>, scalar_prefetch = 0 : i64, scratch_operands = 0 : i64, tpu.core_type = #tpu.core_type<tc>, window_params = [{transform_indices = @transform_0, window_bounds = array<i64: 1, 8, 32>}, {transform_indices = @transform_1, window_bounds = array<i64: 1, 1, 8>}, {pipeline_mode = #tpu.pipeline_mode<synchronous>, transform_indices = @transform_2, window_bounds = array<i64: 1, 32>}, {pipeline_mode = #tpu.pipeline_mode<synchronous>, transform_indices = @transform_3, window_bounds = array<i64: 1, 32>}, {pipeline_mode = #tpu.pipeline_mode<synchronous>, transform_indices = @transform_4, window_bounds = array<i64: 2, 32, 96>}, {pipeline_mode = #tpu.pipeline_mode<synchronous>, transform_indices = @transform_5, window_bounds = array<i64: 2, 1, 96>}, {pipeline_mode = #tpu.pipeline_mode<synchronous>, transform_indices = @transform_6, window_bounds = array<i64: 2, 32, 32>}, {pipeline_mode = #tpu.pipeline_mode<synchronous>, transform_indices = @transform_7, window_bounds = array<i64: 2, 1, 32>}, {pipeline_mode = #tpu.pipeline_mode<synchronous>, transform_indices = @transform_8, window_bounds = array<i64: 2, 1, 32>}, {pipeline_mode = #tpu.pipeline_mode<synchronous>, transform_indices = @transform_9, window_bounds = array<i64: 2, 1, 32>}, {pipeline_mode = #tpu.pipeline_mode<synchronous>, transform_indices = @transform_10, window_bounds = array<i64: 2, 32, 64>}, {pipeline_mode = #tpu.pipeline_mode<synchronous>, transform_indices = @transform_11, window_bounds = array<i64: 2, 1, 64>}, {pipeline_mode = #tpu.pipeline_mode<synchronous>, transform_indices = @transform_12, window_bounds = array<i64: 2, 64, 32>}, {pipeline_mode = #tpu.pipeline_mode<synchronous>, transform_indices = @transform_13, window_bounds = array<i64: 2, 1, 32>}, {pipeline_mode = #tpu.pipeline_mode<synchronous>, transform_indices = @transform_14, window_bounds = array<i64: 2, 1, 32>}, {pipeline_mode = #tpu.pipeline_mode<synchronous>, transform_indices = @transform_15, window_bounds = array<i64: 2, 1, 32>}, {pipeline_mode = #tpu.pipeline_mode<synchronous>, transform_indices = @transform_16, window_bounds = array<i64: 32, 32>}, {pipeline_mode = #tpu.pipeline_mode<synchronous>, transform_indices = @transform_17, window_bounds = array<i64: 1, 32>}, {pipeline_mode = #tpu.pipeline_mode<synchronous>, transform_indices = @transform_18, window_bounds = array<i64: 32, 3>}, {pipeline_mode = #tpu.pipeline_mode<synchronous>, transform_indices = @transform_19, window_bounds = array<i64: 1, 3>}, {transform_indices = @transform_20, window_bounds = array<i64: 1, 1, 3>}]} {
    %c0 = arith.constant 0 : index
    %c0_0 = arith.constant 0 : index
    %c0_1 = arith.constant 0 : index
    %0 = vector.load %arg1[%c0, %c0_0, %c0_1] : memref<1x8x32xf32, #tpu.memory_space<vmem>>, vector<1x8x32xf32>
    %1 = vector.shape_cast %0 : vector<1x8x32xf32> to vector<8x32xf32>
    %c0_2 = arith.constant 0 : index
    %c0_3 = arith.constant 0 : index
    %c0_4 = arith.constant 0 : index
    %2 = vector.load %arg2[%c0_2, %c0_3, %c0_4] : memref<1x1x8xf32, #tpu.memory_space<vmem>>, vector<1x1x8xf32>
    %3 = vector.shape_cast %2 : vector<1x1x8xf32> to vector<1x8xf32>
    %c0_5 = arith.constant 0 : index
    %c0_6 = arith.constant 0 : index
    %4 = vector.load %arg3[%c0_5, %c0_6] : memref<1x32xf32, #tpu.memory_space<vmem>>, vector<1x32xf32>
    %c0_7 = arith.constant 0 : index
    %c0_8 = arith.constant 0 : index
    %5 = vector.load %arg4[%c0_7, %c0_8] : memref<1x32xf32, #tpu.memory_space<vmem>>, vector<1x32xf32>
    %cst = arith.constant dense<0.000000e+00> : vector<8xf32>
    %6 = vector.multi_reduction <add>, %1, %cst [1] : vector<8x32xf32> to vector<8xf32>
    %7 = vector.shape_cast %6 : vector<8xf32> to vector<8x1xf32>
    %cst_9 = arith.constant 3.200000e+01 : f32
    %8 = vector.broadcast %cst_9 : f32 to vector<8x1xf32>
    %9 = arith.divf %7, %8 : vector<8x1xf32>
    %10 = vector.broadcast %9 : vector<8x1xf32> to vector<8x32xf32>
    %11 = arith.subf %1, %10 : vector<8x32xf32>
    %12 = vector.broadcast %9 : vector<8x1xf32> to vector<8x32xf32>
    %13 = arith.subf %1, %12 : vector<8x32xf32>
    %14 = arith.mulf %11, %13 : vector<8x32xf32>
    %cst_10 = arith.constant dense<0.000000e+00> : vector<8xf32>
    %15 = vector.multi_reduction <add>, %14, %cst_10 [1] : vector<8x32xf32> to vector<8xf32>
    %16 = vector.shape_cast %15 : vector<8xf32> to vector<8x1xf32>
    %cst_11 = arith.constant 3.200000e+01 : f32
    %17 = vector.broadcast %cst_11 : f32 to vector<8x1xf32>
    %18 = arith.divf %16, %17 : vector<8x1xf32>
    %19 = vector.broadcast %9 : vector<8x1xf32> to vector<8x32xf32>
    %20 = arith.subf %1, %19 : vector<8x32xf32>
    %cst_12 = arith.constant 9.99999996E-13 : f32
    %21 = vector.broadcast %cst_12 : f32 to vector<8x1xf32>
    %22 = arith.addf %18, %21 : vector<8x1xf32>
    %23 = math.rsqrt %22 : vector<8x1xf32>
    %24 = vector.broadcast %23 : vector<8x1xf32> to vector<8x32xf32>
    %25 = arith.mulf %20, %24 : vector<8x32xf32>
    %26 = vector.broadcast %4 : vector<1x32xf32> to vector<8x32xf32>
    %27 = arith.mulf %25, %26 : vector<8x32xf32>
    %28 = vector.broadcast %5 : vector<1x32xf32> to vector<8x32xf32>
    %29 = arith.addf %27, %28 : vector<8x32xf32>
    %c0_13 = arith.constant 0 : index
    %c0_14 = arith.constant 0 : index
    %c0_15 = arith.constant 0 : index
    %30 = vector.load %arg5[%c0_13, %c0_14, %c0_15] : memref<2x32x96xf32, #tpu.memory_space<vmem>>, vector<1x32x96xf32>
    %31 = vector.shape_cast %30 : vector<1x32x96xf32> to vector<32x96xf32>
    %cst_16 = arith.constant dense<0.000000e+00> : vector<8x96xf32>
    %32 = tpu.matmul %29, %31, %cst_16 {dimension_numbers = #tpu.dot_dimension_numbers<[1], [0], [0], [1], [0, 0, 1, 1], [], []>} : vector<8x32xf32>, vector<32x96xf32>, vector<8x96xf32> -> vector<8x96xf32>
    %c0_17 = arith.constant 0 : index
    %c0_18 = arith.constant 0 : index
    %c0_19 = arith.constant 0 : index
    %33 = vector.load %arg6[%c0_17, %c0_18, %c0_19] : memref<2x1x96xf32, #tpu.memory_space<vmem>>, vector<1x1x96xf32>
    %34 = vector.shape_cast %33 : vector<1x1x96xf32> to vector<1x96xf32>
    %35 = vector.broadcast %34 : vector<1x96xf32> to vector<8x96xf32>
    %36 = arith.addf %32, %35 : vector<8x96xf32>
    %c0_20 = arith.constant 0 : index
    %c0_21 = arith.constant 0 : index
    %c0_22 = arith.constant 0 : index
    %37 = vector.load %arg7[%c0_20, %c0_21, %c0_22] : memref<2x32x32xf32, #tpu.memory_space<vmem>>, vector<1x32x32xf32>
    %38 = vector.shape_cast %37 : vector<1x32x32xf32> to vector<32x32xf32>
    %39 = vector.extract_strided_slice %36 {offsets = [0, 0], sizes = [8, 16], strides = [1, 1]} : vector<8x96xf32> to vector<8x16xf32>
    %40 = vector.extract_strided_slice %36 {offsets = [0, 32], sizes = [8, 16], strides = [1, 1]} : vector<8x96xf32> to vector<8x16xf32>
    %41 = vector.extract_strided_slice %36 {offsets = [0, 64], sizes = [8, 16], strides = [1, 1]} : vector<8x96xf32> to vector<8x16xf32>
    %cst_23 = arith.constant dense<0.000000e+00> : vector<8x8xf32>
    %42 = tpu.matmul %39, %40, %cst_23 {dimension_numbers = #tpu.dot_dimension_numbers<[1], [1], [0], [0], [0, 0, 1, 0], [], []>} : vector<8x16xf32>, vector<8x16xf32>, vector<8x8xf32> -> vector<8x8xf32>
    %43 = vector.broadcast %3 : vector<1x8xf32> to vector<8x8xf32>
    %44 = arith.addf %42, %43 : vector<8x8xf32>
    %cst_24 = arith.constant dense<0xFF800000> : vector<8xf32>
    %45 = vector.multi_reduction <maximumf>, %44, %cst_24 [1] : vector<8x8xf32> to vector<8xf32>
    %46 = vector.shape_cast %45 : vector<8xf32> to vector<8x1xf32>
    %47 = vector.broadcast %46 : vector<8x1xf32> to vector<8x8xf32>
    %48 = arith.subf %44, %47 : vector<8x8xf32>
    %49 = math.exp %48 : vector<8x8xf32>
    %cst_25 = arith.constant dense<0.000000e+00> : vector<8xf32>
    %50 = vector.multi_reduction <add>, %49, %cst_25 [1] : vector<8x8xf32> to vector<8xf32>
    %51 = vector.shape_cast %50 : vector<8xf32> to vector<8x1xf32>
    %52 = tpu.reciprocal %51 {approx = true} : vector<8x1xf32> -> vector<8x1xf32>
    %53 = vector.broadcast %52 : vector<8x1xf32> to vector<8x8xf32>
    %54 = arith.mulf %49, %53 : vector<8x8xf32>
    %cst_26 = arith.constant dense<0.000000e+00> : vector<8x16xf32>
    %55 = tpu.matmul %54, %41, %cst_26 {dimension_numbers = #tpu.dot_dimension_numbers<[1], [0], [0], [1], [0, 0, 1, 1], [], []>} : vector<8x8xf32>, vector<8x16xf32>, vector<8x16xf32> -> vector<8x16xf32>
    %56 = vector.extract_strided_slice %38 {offsets = [0, 0], sizes = [16, 32], strides = [1, 1]} : vector<32x32xf32> to vector<16x32xf32>
    %cst_27 = arith.constant dense<0.000000e+00> : vector<8x32xf32>
    %57 = tpu.matmul %55, %56, %cst_27 {dimension_numbers = #tpu.dot_dimension_numbers<[1], [0], [0], [1], [0, 0, 1, 1], [], []>} : vector<8x16xf32>, vector<16x32xf32>, vector<8x32xf32> -> vector<8x32xf32>
    %58 = vector.extract_strided_slice %36 {offsets = [0, 16], sizes = [8, 16], strides = [1, 1]} : vector<8x96xf32> to vector<8x16xf32>
    %59 = vector.extract_strided_slice %36 {offsets = [0, 48], sizes = [8, 16], strides = [1, 1]} : vector<8x96xf32> to vector<8x16xf32>
    %60 = vector.extract_strided_slice %36 {offsets = [0, 80], sizes = [8, 16], strides = [1, 1]} : vector<8x96xf32> to vector<8x16xf32>
    %cst_28 = arith.constant dense<0.000000e+00> : vector<8x8xf32>
    %61 = tpu.matmul %58, %59, %cst_28 {dimension_numbers = #tpu.dot_dimension_numbers<[1], [1], [0], [0], [0, 0, 1, 0], [], []>} : vector<8x16xf32>, vector<8x16xf32>, vector<8x8xf32> -> vector<8x8xf32>
    %62 = vector.broadcast %3 : vector<1x8xf32> to vector<8x8xf32>
    %63 = arith.addf %61, %62 : vector<8x8xf32>
    %cst_29 = arith.constant dense<0xFF800000> : vector<8xf32>
    %64 = vector.multi_reduction <maximumf>, %63, %cst_29 [1] : vector<8x8xf32> to vector<8xf32>
    %65 = vector.shape_cast %64 : vector<8xf32> to vector<8x1xf32>
    %66 = vector.broadcast %65 : vector<8x1xf32> to vector<8x8xf32>
    %67 = arith.subf %63, %66 : vector<8x8xf32>
    %68 = math.exp %67 : vector<8x8xf32>
    %cst_30 = arith.constant dense<0.000000e+00> : vector<8xf32>
    %69 = vector.multi_reduction <add>, %68, %cst_30 [1] : vector<8x8xf32> to vector<8xf32>
    %70 = vector.shape_cast %69 : vector<8xf32> to vector<8x1xf32>
    %71 = tpu.reciprocal %70 {approx = true} : vector<8x1xf32> -> vector<8x1xf32>
    %72 = vector.broadcast %71 : vector<8x1xf32> to vector<8x8xf32>
    %73 = arith.mulf %68, %72 : vector<8x8xf32>
    %cst_31 = arith.constant dense<0.000000e+00> : vector<8x16xf32>
    %74 = tpu.matmul %73, %60, %cst_31 {dimension_numbers = #tpu.dot_dimension_numbers<[1], [0], [0], [1], [0, 0, 1, 1], [], []>} : vector<8x8xf32>, vector<8x16xf32>, vector<8x16xf32> -> vector<8x16xf32>
    %75 = vector.extract_strided_slice %38 {offsets = [16, 0], sizes = [16, 32], strides = [1, 1]} : vector<32x32xf32> to vector<16x32xf32>
    %cst_32 = arith.constant dense<0.000000e+00> : vector<8x32xf32>
    %76 = tpu.matmul %74, %75, %cst_32 {dimension_numbers = #tpu.dot_dimension_numbers<[1], [0], [0], [1], [0, 0, 1, 1], [], []>} : vector<8x16xf32>, vector<16x32xf32>, vector<8x32xf32> -> vector<8x32xf32>
    %77 = arith.addf %57, %76 : vector<8x32xf32>
    %78 = arith.addf %29, %77 : vector<8x32xf32>
    %c0_33 = arith.constant 0 : index
    %c0_34 = arith.constant 0 : index
    %c0_35 = arith.constant 0 : index
    %79 = vector.load %arg8[%c0_33, %c0_34, %c0_35] : memref<2x1x32xf32, #tpu.memory_space<vmem>>, vector<1x1x32xf32>
    %80 = vector.shape_cast %79 : vector<1x1x32xf32> to vector<1x32xf32>
    %81 = vector.broadcast %80 : vector<1x32xf32> to vector<8x32xf32>
    %82 = arith.addf %78, %81 : vector<8x32xf32>
    %c0_36 = arith.constant 0 : index
    %c0_37 = arith.constant 0 : index
    %c0_38 = arith.constant 0 : index
    %83 = vector.load %arg9[%c0_36, %c0_37, %c0_38] : memref<2x1x32xf32, #tpu.memory_space<vmem>>, vector<1x1x32xf32>
    %84 = vector.shape_cast %83 : vector<1x1x32xf32> to vector<1x32xf32>
    %c0_39 = arith.constant 0 : index
    %c0_40 = arith.constant 0 : index
    %c0_41 = arith.constant 0 : index
    %85 = vector.load %arg10[%c0_39, %c0_40, %c0_41] : memref<2x1x32xf32, #tpu.memory_space<vmem>>, vector<1x1x32xf32>
    %86 = vector.shape_cast %85 : vector<1x1x32xf32> to vector<1x32xf32>
    %cst_42 = arith.constant dense<0.000000e+00> : vector<8xf32>
    %87 = vector.multi_reduction <add>, %82, %cst_42 [1] : vector<8x32xf32> to vector<8xf32>
    %88 = vector.shape_cast %87 : vector<8xf32> to vector<8x1xf32>
    %cst_43 = arith.constant 3.200000e+01 : f32
    %89 = vector.broadcast %cst_43 : f32 to vector<8x1xf32>
    %90 = arith.divf %88, %89 : vector<8x1xf32>
    %91 = vector.broadcast %90 : vector<8x1xf32> to vector<8x32xf32>
    %92 = arith.subf %82, %91 : vector<8x32xf32>
    %93 = vector.broadcast %90 : vector<8x1xf32> to vector<8x32xf32>
    %94 = arith.subf %82, %93 : vector<8x32xf32>
    %95 = arith.mulf %92, %94 : vector<8x32xf32>
    %cst_44 = arith.constant dense<0.000000e+00> : vector<8xf32>
    %96 = vector.multi_reduction <add>, %95, %cst_44 [1] : vector<8x32xf32> to vector<8xf32>
    %97 = vector.shape_cast %96 : vector<8xf32> to vector<8x1xf32>
    %cst_45 = arith.constant 3.200000e+01 : f32
    %98 = vector.broadcast %cst_45 : f32 to vector<8x1xf32>
    %99 = arith.divf %97, %98 : vector<8x1xf32>
    %100 = vector.broadcast %90 : vector<8x1xf32> to vector<8x32xf32>
    %101 = arith.subf %82, %100 : vector<8x32xf32>
    %cst_46 = arith.constant 9.99999996E-13 : f32
    %102 = vector.broadcast %cst_46 : f32 to vector<8x1xf32>
    %103 = arith.addf %99, %102 : vector<8x1xf32>
    %104 = math.rsqrt %103 : vector<8x1xf32>
    %105 = vector.broadcast %104 : vector<8x1xf32> to vector<8x32xf32>
    %106 = arith.mulf %101, %105 : vector<8x32xf32>
    %107 = vector.broadcast %84 : vector<1x32xf32> to vector<8x32xf32>
    %108 = arith.mulf %106, %107 : vector<8x32xf32>
    %109 = vector.broadcast %86 : vector<1x32xf32> to vector<8x32xf32>
    %110 = arith.addf %108, %109 : vector<8x32xf32>
    %c0_47 = arith.constant 0 : index
    %c0_48 = arith.constant 0 : index
    %c0_49 = arith.constant 0 : index
    %111 = vector.load %arg11[%c0_47, %c0_48, %c0_49] : memref<2x32x64xf32, #tpu.memory_space<vmem>>, vector<1x32x64xf32>
    %112 = vector.shape_cast %111 : vector<1x32x64xf32> to vector<32x64xf32>
    %cst_50 = arith.constant dense<0.000000e+00> : vector<8x64xf32>
    %113 = tpu.matmul %110, %112, %cst_50 {dimension_numbers = #tpu.dot_dimension_numbers<[1], [0], [0], [1], [0, 0, 1, 1], [], []>} : vector<8x32xf32>, vector<32x64xf32>, vector<8x64xf32> -> vector<8x64xf32>
    %c0_51 = arith.constant 0 : index
    %c0_52 = arith.constant 0 : index
    %c0_53 = arith.constant 0 : index
    %114 = vector.load %arg12[%c0_51, %c0_52, %c0_53] : memref<2x1x64xf32, #tpu.memory_space<vmem>>, vector<1x1x64xf32>
    %115 = vector.shape_cast %114 : vector<1x1x64xf32> to vector<1x64xf32>
    %116 = vector.broadcast %115 : vector<1x64xf32> to vector<8x64xf32>
    %117 = arith.addf %113, %116 : vector<8x64xf32>
    %cst_54 = arith.constant 5.000000e-01 : f32
    %118 = vector.broadcast %cst_54 : f32 to vector<8x64xf32>
    %119 = arith.mulf %118, %117 : vector<8x64xf32>
    %cst_55 = arith.constant 4.471500e-02 : f32
    %120 = vector.broadcast %cst_55 : f32 to vector<8x64xf32>
    %121 = arith.mulf %120, %117 : vector<8x64xf32>
    %122 = arith.mulf %121, %117 : vector<8x64xf32>
    %123 = arith.mulf %122, %117 : vector<8x64xf32>
    %124 = arith.addf %117, %123 : vector<8x64xf32>
    %cst_56 = arith.constant 0.797884583 : f32
    %125 = vector.broadcast %cst_56 : f32 to vector<8x64xf32>
    %126 = arith.mulf %125, %124 : vector<8x64xf32>
    %127 = math.tanh %126 : vector<8x64xf32>
    %cst_57 = arith.constant 1.000000e+00 : f32
    %128 = vector.broadcast %cst_57 : f32 to vector<8x64xf32>
    %129 = arith.addf %128, %127 : vector<8x64xf32>
    %130 = arith.mulf %119, %129 : vector<8x64xf32>
    %c0_58 = arith.constant 0 : index
    %c0_59 = arith.constant 0 : index
    %c0_60 = arith.constant 0 : index
    %131 = vector.load %arg13[%c0_58, %c0_59, %c0_60] : memref<2x64x32xf32, #tpu.memory_space<vmem>>, vector<1x64x32xf32>
    %132 = vector.shape_cast %131 : vector<1x64x32xf32> to vector<64x32xf32>
    %cst_61 = arith.constant dense<0.000000e+00> : vector<8x32xf32>
    %133 = tpu.matmul %130, %132, %cst_61 {dimension_numbers = #tpu.dot_dimension_numbers<[1], [0], [0], [1], [0, 0, 1, 1], [], []>} : vector<8x64xf32>, vector<64x32xf32>, vector<8x32xf32> -> vector<8x32xf32>
    %c0_62 = arith.constant 0 : index
    %c0_63 = arith.constant 0 : index
    %c0_64 = arith.constant 0 : index
    %134 = vector.load %arg14[%c0_62, %c0_63, %c0_64] : memref<2x1x32xf32, #tpu.memory_space<vmem>>, vector<1x1x32xf32>
    %135 = vector.shape_cast %134 : vector<1x1x32xf32> to vector<1x32xf32>
    %136 = vector.broadcast %135 : vector<1x32xf32> to vector<8x32xf32>
    %137 = arith.addf %133, %136 : vector<8x32xf32>
    %138 = arith.addf %110, %137 : vector<8x32xf32>
    %c0_65 = arith.constant 0 : index
    %c0_66 = arith.constant 0 : index
    %c0_67 = arith.constant 0 : index
    %139 = vector.load %arg15[%c0_65, %c0_66, %c0_67] : memref<2x1x32xf32, #tpu.memory_space<vmem>>, vector<1x1x32xf32>
    %140 = vector.shape_cast %139 : vector<1x1x32xf32> to vector<1x32xf32>
    %c0_68 = arith.constant 0 : index
    %c0_69 = arith.constant 0 : index
    %c0_70 = arith.constant 0 : index
    %141 = vector.load %arg16[%c0_68, %c0_69, %c0_70] : memref<2x1x32xf32, #tpu.memory_space<vmem>>, vector<1x1x32xf32>
    %142 = vector.shape_cast %141 : vector<1x1x32xf32> to vector<1x32xf32>
    %cst_71 = arith.constant dense<0.000000e+00> : vector<8xf32>
    %143 = vector.multi_reduction <add>, %138, %cst_71 [1] : vector<8x32xf32> to vector<8xf32>
    %144 = vector.shape_cast %143 : vector<8xf32> to vector<8x1xf32>
    %cst_72 = arith.constant 3.200000e+01 : f32
    %145 = vector.broadcast %cst_72 : f32 to vector<8x1xf32>
    %146 = arith.divf %144, %145 : vector<8x1xf32>
    %147 = vector.broadcast %146 : vector<8x1xf32> to vector<8x32xf32>
    %148 = arith.subf %138, %147 : vector<8x32xf32>
    %149 = vector.broadcast %146 : vector<8x1xf32> to vector<8x32xf32>
    %150 = arith.subf %138, %149 : vector<8x32xf32>
    %151 = arith.mulf %148, %150 : vector<8x32xf32>
    %cst_73 = arith.constant dense<0.000000e+00> : vector<8xf32>
    %152 = vector.multi_reduction <add>, %151, %cst_73 [1] : vector<8x32xf32> to vector<8xf32>
    %153 = vector.shape_cast %152 : vector<8xf32> to vector<8x1xf32>
    %cst_74 = arith.constant 3.200000e+01 : f32
    %154 = vector.broadcast %cst_74 : f32 to vector<8x1xf32>
    %155 = arith.divf %153, %154 : vector<8x1xf32>
    %156 = vector.broadcast %146 : vector<8x1xf32> to vector<8x32xf32>
    %157 = arith.subf %138, %156 : vector<8x32xf32>
    %cst_75 = arith.constant 9.99999996E-13 : f32
    %158 = vector.broadcast %cst_75 : f32 to vector<8x1xf32>
    %159 = arith.addf %155, %158 : vector<8x1xf32>
    %160 = math.rsqrt %159 : vector<8x1xf32>
    %161 = vector.broadcast %160 : vector<8x1xf32> to vector<8x32xf32>
    %162 = arith.mulf %157, %161 : vector<8x32xf32>
    %163 = vector.broadcast %140 : vector<1x32xf32> to vector<8x32xf32>
    %164 = arith.mulf %162, %163 : vector<8x32xf32>
    %165 = vector.broadcast %142 : vector<1x32xf32> to vector<8x32xf32>
    %166 = arith.addf %164, %165 : vector<8x32xf32>
    %c1 = arith.constant 1 : index
    %c0_76 = arith.constant 0 : index
    %c0_77 = arith.constant 0 : index
    %167 = vector.load %arg5[%c1, %c0_76, %c0_77] : memref<2x32x96xf32, #tpu.memory_space<vmem>>, vector<1x32x96xf32>
    %168 = vector.shape_cast %167 : vector<1x32x96xf32> to vector<32x96xf32>
    %cst_78 = arith.constant dense<0.000000e+00> : vector<8x96xf32>
    %169 = tpu.matmul %166, %168, %cst_78 {dimension_numbers = #tpu.dot_dimension_numbers<[1], [0], [0], [1], [0, 0, 1, 1], [], []>} : vector<8x32xf32>, vector<32x96xf32>, vector<8x96xf32> -> vector<8x96xf32>
    %c1_79 = arith.constant 1 : index
    %c0_80 = arith.constant 0 : index
    %c0_81 = arith.constant 0 : index
    %170 = vector.load %arg6[%c1_79, %c0_80, %c0_81] : memref<2x1x96xf32, #tpu.memory_space<vmem>>, vector<1x1x96xf32>
    %171 = vector.shape_cast %170 : vector<1x1x96xf32> to vector<1x96xf32>
    %172 = vector.broadcast %171 : vector<1x96xf32> to vector<8x96xf32>
    %173 = arith.addf %169, %172 : vector<8x96xf32>
    %c1_82 = arith.constant 1 : index
    %c0_83 = arith.constant 0 : index
    %c0_84 = arith.constant 0 : index
    %174 = vector.load %arg7[%c1_82, %c0_83, %c0_84] : memref<2x32x32xf32, #tpu.memory_space<vmem>>, vector<1x32x32xf32>
    %175 = vector.shape_cast %174 : vector<1x32x32xf32> to vector<32x32xf32>
    %176 = vector.extract_strided_slice %173 {offsets = [0, 0], sizes = [1, 96], strides = [1, 1]} : vector<8x96xf32> to vector<1x96xf32>
    %177 = vector.extract_strided_slice %166 {offsets = [0, 0], sizes = [1, 32], strides = [1, 1]} : vector<8x32xf32> to vector<1x32xf32>
    %178 = vector.extract_strided_slice %176 {offsets = [0, 0], sizes = [1, 16], strides = [1, 1]} : vector<1x96xf32> to vector<1x16xf32>
    %179 = vector.extract_strided_slice %173 {offsets = [0, 32], sizes = [8, 16], strides = [1, 1]} : vector<8x96xf32> to vector<8x16xf32>
    %180 = vector.extract_strided_slice %173 {offsets = [0, 64], sizes = [8, 16], strides = [1, 1]} : vector<8x96xf32> to vector<8x16xf32>
    %cst_85 = arith.constant dense<0.000000e+00> : vector<1x8xf32>
    %181 = tpu.matmul %178, %179, %cst_85 {dimension_numbers = #tpu.dot_dimension_numbers<[1], [1], [0], [0], [0, 0, 1, 0], [], []>} : vector<1x16xf32>, vector<8x16xf32>, vector<1x8xf32> -> vector<1x8xf32>
    %182 = arith.addf %181, %3 : vector<1x8xf32>
    %cst_86 = arith.constant dense<0xFF800000> : vector<1xf32>
    %183 = vector.multi_reduction <maximumf>, %182, %cst_86 [1] : vector<1x8xf32> to vector<1xf32>
    %184 = vector.shape_cast %183 : vector<1xf32> to vector<1x1xf32>
    %185 = vector.broadcast %184 : vector<1x1xf32> to vector<1x8xf32>
    %186 = arith.subf %182, %185 : vector<1x8xf32>
    %187 = math.exp %186 : vector<1x8xf32>
    %cst_87 = arith.constant dense<0.000000e+00> : vector<1xf32>
    %188 = vector.multi_reduction <add>, %187, %cst_87 [1] : vector<1x8xf32> to vector<1xf32>
    %189 = vector.shape_cast %188 : vector<1xf32> to vector<1x1xf32>
    %190 = tpu.reciprocal %189 {approx = true} : vector<1x1xf32> -> vector<1x1xf32>
    %191 = vector.broadcast %190 : vector<1x1xf32> to vector<1x8xf32>
    %192 = arith.mulf %187, %191 : vector<1x8xf32>
    %cst_88 = arith.constant dense<0.000000e+00> : vector<1x16xf32>
    %193 = tpu.matmul %192, %180, %cst_88 {dimension_numbers = #tpu.dot_dimension_numbers<[1], [0], [0], [1], [0, 0, 1, 1], [], []>} : vector<1x8xf32>, vector<8x16xf32>, vector<1x16xf32> -> vector<1x16xf32>
    %194 = vector.extract_strided_slice %175 {offsets = [0, 0], sizes = [16, 32], strides = [1, 1]} : vector<32x32xf32> to vector<16x32xf32>
    %cst_89 = arith.constant dense<0.000000e+00> : vector<1x32xf32>
    %195 = tpu.matmul %193, %194, %cst_89 {dimension_numbers = #tpu.dot_dimension_numbers<[1], [0], [0], [1], [0, 0, 1, 1], [], []>} : vector<1x16xf32>, vector<16x32xf32>, vector<1x32xf32> -> vector<1x32xf32>
    %196 = vector.extract_strided_slice %176 {offsets = [0, 16], sizes = [1, 16], strides = [1, 1]} : vector<1x96xf32> to vector<1x16xf32>
    %197 = vector.extract_strided_slice %173 {offsets = [0, 48], sizes = [8, 16], strides = [1, 1]} : vector<8x96xf32> to vector<8x16xf32>
    %198 = vector.extract_strided_slice %173 {offsets = [0, 80], sizes = [8, 16], strides = [1, 1]} : vector<8x96xf32> to vector<8x16xf32>
    %cst_90 = arith.constant dense<0.000000e+00> : vector<1x8xf32>
    %199 = tpu.matmul %196, %197, %cst_90 {dimension_numbers = #tpu.dot_dimension_numbers<[1], [1], [0], [0], [0, 0, 1, 0], [], []>} : vector<1x16xf32>, vector<8x16xf32>, vector<1x8xf32> -> vector<1x8xf32>
    %200 = arith.addf %199, %3 : vector<1x8xf32>
    %cst_91 = arith.constant dense<0xFF800000> : vector<1xf32>
    %201 = vector.multi_reduction <maximumf>, %200, %cst_91 [1] : vector<1x8xf32> to vector<1xf32>
    %202 = vector.shape_cast %201 : vector<1xf32> to vector<1x1xf32>
    %203 = vector.broadcast %202 : vector<1x1xf32> to vector<1x8xf32>
    %204 = arith.subf %200, %203 : vector<1x8xf32>
    %205 = math.exp %204 : vector<1x8xf32>
    %cst_92 = arith.constant dense<0.000000e+00> : vector<1xf32>
    %206 = vector.multi_reduction <add>, %205, %cst_92 [1] : vector<1x8xf32> to vector<1xf32>
    %207 = vector.shape_cast %206 : vector<1xf32> to vector<1x1xf32>
    %208 = tpu.reciprocal %207 {approx = true} : vector<1x1xf32> -> vector<1x1xf32>
    %209 = vector.broadcast %208 : vector<1x1xf32> to vector<1x8xf32>
    %210 = arith.mulf %205, %209 : vector<1x8xf32>
    %cst_93 = arith.constant dense<0.000000e+00> : vector<1x16xf32>
    %211 = tpu.matmul %210, %198, %cst_93 {dimension_numbers = #tpu.dot_dimension_numbers<[1], [0], [0], [1], [0, 0, 1, 1], [], []>} : vector<1x8xf32>, vector<8x16xf32>, vector<1x16xf32> -> vector<1x16xf32>
    %212 = vector.extract_strided_slice %175 {offsets = [16, 0], sizes = [16, 32], strides = [1, 1]} : vector<32x32xf32> to vector<16x32xf32>
    %cst_94 = arith.constant dense<0.000000e+00> : vector<1x32xf32>
    %213 = tpu.matmul %211, %212, %cst_94 {dimension_numbers = #tpu.dot_dimension_numbers<[1], [0], [0], [1], [0, 0, 1, 1], [], []>} : vector<1x16xf32>, vector<16x32xf32>, vector<1x32xf32> -> vector<1x32xf32>
    %214 = arith.addf %195, %213 : vector<1x32xf32>
    %215 = arith.addf %177, %214 : vector<1x32xf32>
    %c1_95 = arith.constant 1 : index
    %c0_96 = arith.constant 0 : index
    %c0_97 = arith.constant 0 : index
    %216 = vector.load %arg8[%c1_95, %c0_96, %c0_97] : memref<2x1x32xf32, #tpu.memory_space<vmem>>, vector<1x1x32xf32>
    %217 = vector.shape_cast %216 : vector<1x1x32xf32> to vector<1x32xf32>
    %218 = arith.addf %215, %217 : vector<1x32xf32>
    %c1_98 = arith.constant 1 : index
    %c0_99 = arith.constant 0 : index
    %c0_100 = arith.constant 0 : index
    %219 = vector.load %arg9[%c1_98, %c0_99, %c0_100] : memref<2x1x32xf32, #tpu.memory_space<vmem>>, vector<1x1x32xf32>
    %220 = vector.shape_cast %219 : vector<1x1x32xf32> to vector<1x32xf32>
    %c1_101 = arith.constant 1 : index
    %c0_102 = arith.constant 0 : index
    %c0_103 = arith.constant 0 : index
    %221 = vector.load %arg10[%c1_101, %c0_102, %c0_103] : memref<2x1x32xf32, #tpu.memory_space<vmem>>, vector<1x1x32xf32>
    %222 = vector.shape_cast %221 : vector<1x1x32xf32> to vector<1x32xf32>
    %cst_104 = arith.constant dense<0.000000e+00> : vector<1xf32>
    %223 = vector.multi_reduction <add>, %218, %cst_104 [1] : vector<1x32xf32> to vector<1xf32>
    %224 = vector.shape_cast %223 : vector<1xf32> to vector<1x1xf32>
    %cst_105 = arith.constant 3.200000e+01 : f32
    %225 = vector.broadcast %cst_105 : f32 to vector<1x1xf32>
    %226 = arith.divf %224, %225 : vector<1x1xf32>
    %227 = vector.broadcast %226 : vector<1x1xf32> to vector<1x32xf32>
    %228 = arith.subf %218, %227 : vector<1x32xf32>
    %229 = vector.broadcast %226 : vector<1x1xf32> to vector<1x32xf32>
    %230 = arith.subf %218, %229 : vector<1x32xf32>
    %231 = arith.mulf %228, %230 : vector<1x32xf32>
    %cst_106 = arith.constant dense<0.000000e+00> : vector<1xf32>
    %232 = vector.multi_reduction <add>, %231, %cst_106 [1] : vector<1x32xf32> to vector<1xf32>
    %233 = vector.shape_cast %232 : vector<1xf32> to vector<1x1xf32>
    %cst_107 = arith.constant 3.200000e+01 : f32
    %234 = vector.broadcast %cst_107 : f32 to vector<1x1xf32>
    %235 = arith.divf %233, %234 : vector<1x1xf32>
    %236 = vector.broadcast %226 : vector<1x1xf32> to vector<1x32xf32>
    %237 = arith.subf %218, %236 : vector<1x32xf32>
    %cst_108 = arith.constant 9.99999996E-13 : f32
    %238 = vector.broadcast %cst_108 : f32 to vector<1x1xf32>
    %239 = arith.addf %235, %238 : vector<1x1xf32>
    %240 = math.rsqrt %239 : vector<1x1xf32>
    %241 = vector.broadcast %240 : vector<1x1xf32> to vector<1x32xf32>
    %242 = arith.mulf %237, %241 : vector<1x32xf32>
    %243 = arith.mulf %242, %220 : vector<1x32xf32>
    %244 = arith.addf %243, %222 : vector<1x32xf32>
    %c1_109 = arith.constant 1 : index
    %c0_110 = arith.constant 0 : index
    %c0_111 = arith.constant 0 : index
    %245 = vector.load %arg11[%c1_109, %c0_110, %c0_111] : memref<2x32x64xf32, #tpu.memory_space<vmem>>, vector<1x32x64xf32>
    %246 = vector.shape_cast %245 : vector<1x32x64xf32> to vector<32x64xf32>
    %cst_112 = arith.constant dense<0.000000e+00> : vector<1x64xf32>
    %247 = tpu.matmul %244, %246, %cst_112 {dimension_numbers = #tpu.dot_dimension_numbers<[1], [0], [0], [1], [0, 0, 1, 1], [], []>} : vector<1x32xf32>, vector<32x64xf32>, vector<1x64xf32> -> vector<1x64xf32>
    %c1_113 = arith.constant 1 : index
    %c0_114 = arith.constant 0 : index
    %c0_115 = arith.constant 0 : index
    %248 = vector.load %arg12[%c1_113, %c0_114, %c0_115] : memref<2x1x64xf32, #tpu.memory_space<vmem>>, vector<1x1x64xf32>
    %249 = vector.shape_cast %248 : vector<1x1x64xf32> to vector<1x64xf32>
    %250 = arith.addf %247, %249 : vector<1x64xf32>
    %cst_116 = arith.constant 5.000000e-01 : f32
    %251 = vector.broadcast %cst_116 : f32 to vector<1x64xf32>
    %252 = arith.mulf %251, %250 : vector<1x64xf32>
    %cst_117 = arith.constant 4.471500e-02 : f32
    %253 = vector.broadcast %cst_117 : f32 to vector<1x64xf32>
    %254 = arith.mulf %253, %250 : vector<1x64xf32>
    %255 = arith.mulf %254, %250 : vector<1x64xf32>
    %256 = arith.mulf %255, %250 : vector<1x64xf32>
    %257 = arith.addf %250, %256 : vector<1x64xf32>
    %cst_118 = arith.constant 0.797884583 : f32
    %258 = vector.broadcast %cst_118 : f32 to vector<1x64xf32>
    %259 = arith.mulf %258, %257 : vector<1x64xf32>
    %260 = math.tanh %259 : vector<1x64xf32>
    %cst_119 = arith.constant 1.000000e+00 : f32
    %261 = vector.broadcast %cst_119 : f32 to vector<1x64xf32>
    %262 = arith.addf %261, %260 : vector<1x64xf32>
    %263 = arith.mulf %252, %262 : vector<1x64xf32>
    %c1_120 = arith.constant 1 : index
    %c0_121 = arith.constant 0 : index
    %c0_122 = arith.constant 0 : index
    %264 = vector.load %arg13[%c1_120, %c0_121, %c0_122] : memref<2x64x32xf32, #tpu.memory_space<vmem>>, vector<1x64x32xf32>
    %265 = vector.shape_cast %264 : vector<1x64x32xf32> to vector<64x32xf32>
    %cst_123 = arith.constant dense<0.000000e+00> : vector<1x32xf32>
    %266 = tpu.matmul %263, %265, %cst_123 {dimension_numbers = #tpu.dot_dimension_numbers<[1], [0], [0], [1], [0, 0, 1, 1], [], []>} : vector<1x64xf32>, vector<64x32xf32>, vector<1x32xf32> -> vector<1x32xf32>
    %c1_124 = arith.constant 1 : index
    %c0_125 = arith.constant 0 : index
    %c0_126 = arith.constant 0 : index
    %267 = vector.load %arg14[%c1_124, %c0_125, %c0_126] : memref<2x1x32xf32, #tpu.memory_space<vmem>>, vector<1x1x32xf32>
    %268 = vector.shape_cast %267 : vector<1x1x32xf32> to vector<1x32xf32>
    %269 = arith.addf %266, %268 : vector<1x32xf32>
    %270 = arith.addf %244, %269 : vector<1x32xf32>
    %c1_127 = arith.constant 1 : index
    %c0_128 = arith.constant 0 : index
    %c0_129 = arith.constant 0 : index
    %271 = vector.load %arg15[%c1_127, %c0_128, %c0_129] : memref<2x1x32xf32, #tpu.memory_space<vmem>>, vector<1x1x32xf32>
    %272 = vector.shape_cast %271 : vector<1x1x32xf32> to vector<1x32xf32>
    %c1_130 = arith.constant 1 : index
    %c0_131 = arith.constant 0 : index
    %c0_132 = arith.constant 0 : index
    %273 = vector.load %arg16[%c1_130, %c0_131, %c0_132] : memref<2x1x32xf32, #tpu.memory_space<vmem>>, vector<1x1x32xf32>
    %274 = vector.shape_cast %273 : vector<1x1x32xf32> to vector<1x32xf32>
    %cst_133 = arith.constant dense<0.000000e+00> : vector<1xf32>
    %275 = vector.multi_reduction <add>, %270, %cst_133 [1] : vector<1x32xf32> to vector<1xf32>
    %276 = vector.shape_cast %275 : vector<1xf32> to vector<1x1xf32>
    %cst_134 = arith.constant 3.200000e+01 : f32
    %277 = vector.broadcast %cst_134 : f32 to vector<1x1xf32>
    %278 = arith.divf %276, %277 : vector<1x1xf32>
    %279 = vector.broadcast %278 : vector<1x1xf32> to vector<1x32xf32>
    %280 = arith.subf %270, %279 : vector<1x32xf32>
    %281 = vector.broadcast %278 : vector<1x1xf32> to vector<1x32xf32>
    %282 = arith.subf %270, %281 : vector<1x32xf32>
    %283 = arith.mulf %280, %282 : vector<1x32xf32>
    %cst_135 = arith.constant dense<0.000000e+00> : vector<1xf32>
    %284 = vector.multi_reduction <add>, %283, %cst_135 [1] : vector<1x32xf32> to vector<1xf32>
    %285 = vector.shape_cast %284 : vector<1xf32> to vector<1x1xf32>
    %cst_136 = arith.constant 3.200000e+01 : f32
    %286 = vector.broadcast %cst_136 : f32 to vector<1x1xf32>
    %287 = arith.divf %285, %286 : vector<1x1xf32>
    %288 = vector.broadcast %278 : vector<1x1xf32> to vector<1x32xf32>
    %289 = arith.subf %270, %288 : vector<1x32xf32>
    %cst_137 = arith.constant 9.99999996E-13 : f32
    %290 = vector.broadcast %cst_137 : f32 to vector<1x1xf32>
    %291 = arith.addf %287, %290 : vector<1x1xf32>
    %292 = math.rsqrt %291 : vector<1x1xf32>
    %293 = vector.broadcast %292 : vector<1x1xf32> to vector<1x32xf32>
    %294 = arith.mulf %289, %293 : vector<1x32xf32>
    %295 = arith.mulf %294, %272 : vector<1x32xf32>
    %296 = arith.addf %295, %274 : vector<1x32xf32>
    %c0_138 = arith.constant 0 : index
    %c0_139 = arith.constant 0 : index
    %297 = vector.load %arg17[%c0_138, %c0_139] : memref<32x32xf32, #tpu.memory_space<vmem>>, vector<32x32xf32>
    %cst_140 = arith.constant dense<0.000000e+00> : vector<1x32xf32>
    %298 = tpu.matmul %296, %297, %cst_140 {dimension_numbers = #tpu.dot_dimension_numbers<[1], [0], [0], [1], [0, 0, 1, 1], [], []>} : vector<1x32xf32>, vector<32x32xf32>, vector<1x32xf32> -> vector<1x32xf32>
    %c0_141 = arith.constant 0 : index
    %c0_142 = arith.constant 0 : index
    %299 = vector.load %arg18[%c0_141, %c0_142] : memref<1x32xf32, #tpu.memory_space<vmem>>, vector<1x32xf32>
    %300 = arith.addf %298, %299 : vector<1x32xf32>
    %301 = math.tanh %300 : vector<1x32xf32>
    %c0_143 = arith.constant 0 : index
    %c0_144 = arith.constant 0 : index
    %302 = vector.load %arg19[%c0_143, %c0_144] : memref<32x3xf32, #tpu.memory_space<vmem>>, vector<32x3xf32>
    %cst_145 = arith.constant dense<0.000000e+00> : vector<1x3xf32>
    %303 = tpu.matmul %301, %302, %cst_145 {dimension_numbers = #tpu.dot_dimension_numbers<[1], [0], [0], [1], [0, 0, 1, 1], [], []>} : vector<1x32xf32>, vector<32x3xf32>, vector<1x3xf32> -> vector<1x3xf32>
    %c0_146 = arith.constant 0 : index
    %c0_147 = arith.constant 0 : index
    %304 = vector.load %arg20[%c0_146, %c0_147] : memref<1x3xf32, #tpu.memory_space<vmem>>, vector<1x3xf32>
    %305 = arith.addf %303, %304 : vector<1x3xf32>
    %cst_148 = arith.constant dense<0xFF800000> : vector<1xf32>
    %306 = vector.multi_reduction <maximumf>, %305, %cst_148 [1] : vector<1x3xf32> to vector<1xf32>
    %307 = vector.shape_cast %306 : vector<1xf32> to vector<1x1xf32>
    %308 = vector.broadcast %307 : vector<1x1xf32> to vector<1x3xf32>
    %309 = arith.subf %305, %308 : vector<1x3xf32>
    %310 = math.exp %309 : vector<1x3xf32>
    %cst_149 = arith.constant dense<0.000000e+00> : vector<1xf32>
    %311 = vector.multi_reduction <add>, %310, %cst_149 [1] : vector<1x3xf32> to vector<1xf32>
    %312 = vector.shape_cast %311 : vector<1xf32> to vector<1x1xf32>
    %313 = vector.broadcast %312 : vector<1x1xf32> to vector<1x3xf32>
    %314 = arith.divf %310, %313 : vector<1x3xf32>
    %c0_150 = arith.constant 0 : index
    %c0_151 = arith.constant 0 : index
    %c0_152 = arith.constant 0 : index
    %315 = vector.load %arg21[%c0_150, %c0_151, %c0_152] : memref<1x1x3xf32, #tpu.memory_space<vmem>>, vector<1x1x3xf32>
    %316 = vector.shape_cast %315 : vector<1x1x3xf32> to vector<1x3xf32>
    %317 = vector.shape_cast %314 : vector<1x3xf32> to vector<1x1x3xf32>
    tpu.vector_store %arg21[%c0_150, %c0_151, %c0_152], %317 {strides = array<i32>} : memref<1x1x3xf32, #tpu.memory_space<vmem>>, vector<1x1x3xf32>,
    return
  }
  func.func @transform_0(%arg0: i32) -> (i32, i32, i32) {
    %c0_i32 = arith.constant 0 : i32
    %c0_i32_0 = arith.constant 0 : i32
    %c0_i32_1 = arith.constant 0 : i32
    return %arg0, %c0_i32, %c0_i32_0 : i32, i32, i32
  }
  func.func @transform_1(%arg0: i32) -> (i32, i32, i32) {
    %c0_i32 = arith.constant 0 : i32
    %c0_i32_0 = arith.constant 0 : i32
    %c0_i32_1 = arith.constant 0 : i32
    return %arg0, %c0_i32, %c0_i32_0 : i32, i32, i32
  }
  func.func @transform_2(%arg0: i32) -> (i32, i32) {
    %c0_i32 = arith.constant 0 : i32
    %c0_i32_0 = arith.constant 0 : i32
    %c0_i32_1 = arith.constant 0 : i32
    return %c0_i32, %c0_i32_0 : i32, i32
  }
  func.func @transform_3(%arg0: i32) -> (i32, i32) {
    %c0_i32 = arith.constant 0 : i32
    %c0_i32_0 = arith.constant 0 : i32
    %c0_i32_1 = arith.constant 0 : i32
    return %c0_i32, %c0_i32_0 : i32, i32
  }
  func.func @transform_4(%arg0: i32) -> (i32, i32, i32) {
    %c0_i32 = arith.constant 0 : i32
    %c0_i32_0 = arith.constant 0 : i32
    %c0_i32_1 = arith.constant 0 : i32
    %c0_i32_2 = arith.constant 0 : i32
    return %c0_i32, %c0_i32_0, %c0_i32_1 : i32, i32, i32
  }
  func.func @transform_5(%arg0: i32) -> (i32, i32, i32) {
    %c0_i32 = arith.constant 0 : i32
    %c0_i32_0 = arith.constant 0 : i32
    %c0_i32_1 = arith.constant 0 : i32
    %c0_i32_2 = arith.constant 0 : i32
    return %c0_i32, %c0_i32_0, %c0_i32_1 : i32, i32, i32
  }
  func.func @transform_6(%arg0: i32) -> (i32, i32, i32) {
    %c0_i32 = arith.constant 0 : i32
    %c0_i32_0 = arith.constant 0 : i32
    %c0_i32_1 = arith.constant 0 : i32
    %c0_i32_2 = arith.constant 0 : i32
    return %c0_i32, %c0_i32_0, %c0_i32_1 : i32, i32, i32
  }
  func.func @transform_7(%arg0: i32) -> (i32, i32, i32) {
    %c0_i32 = arith.constant 0 : i32
    %c0_i32_0 = arith.constant 0 : i32
    %c0_i32_1 = arith.constant 0 : i32
    %c0_i32_2 = arith.constant 0 : i32
    return %c0_i32, %c0_i32_0, %c0_i32_1 : i32, i32, i32
  }
  func.func @transform_8(%arg0: i32) -> (i32, i32, i32) {
    %c0_i32 = arith.constant 0 : i32
    %c0_i32_0 = arith.constant 0 : i32
    %c0_i32_1 = arith.constant 0 : i32
    %c0_i32_2 = arith.constant 0 : i32
    return %c0_i32, %c0_i32_0, %c0_i32_1 : i32, i32, i32
  }
  func.func @transform_9(%arg0: i32) -> (i32, i32, i32) {
    %c0_i32 = arith.constant 0 : i32
    %c0_i32_0 = arith.constant 0 : i32
    %c0_i32_1 = arith.constant 0 : i32
    %c0_i32_2 = arith.constant 0 : i32
    return %c0_i32, %c0_i32_0, %c0_i32_1 : i32, i32, i32
  }
  func.func @transform_10(%arg0: i32) -> (i32, i32, i32) {
    %c0_i32 = arith.constant 0 : i32
    %c0_i32_0 = arith.constant 0 : i32
    %c0_i32_1 = arith.constant 0 : i32
    %c0_i32_2 = arith.constant 0 : i32
    return %c0_i32, %c0_i32_0, %c0_i32_1 : i32, i32, i32
  }
  func.func @transform_11(%arg0: i32) -> (i32, i32, i32) {
    %c0_i32 = arith.constant 0 : i32
    %c0_i32_0 = arith.constant 0 : i32
    %c0_i32_1 = arith.constant 0 : i32
    %c0_i32_2 = arith.constant 0 : i32
    return %c0_i32, %c0_i32_0, %c0_i32_1 : i32, i32, i32
  }
  func.func @transform_12(%arg0: i32) -> (i32, i32, i32) {
    %c0_i32 = arith.constant 0 : i32
    %c0_i32_0 = arith.constant 0 : i32
    %c0_i32_1 = arith.constant 0 : i32
    %c0_i32_2 = arith.constant 0 : i32
    return %c0_i32, %c0_i32_0, %c0_i32_1 : i32, i32, i32
  }
  func.func @transform_13(%arg0: i32) -> (i32, i32, i32) {
    %c0_i32 = arith.constant 0 : i32
    %c0_i32_0 = arith.constant 0 : i32
    %c0_i32_1 = arith.constant 0 : i32
    %c0_i32_2 = arith.constant 0 : i32
    return %c0_i32, %c0_i32_0, %c0_i32_1 : i32, i32, i32
  }
  func.func @transform_14(%arg0: i32) -> (i32, i32, i32) {
    %c0_i32 = arith.constant 0 : i32
    %c0_i32_0 = arith.constant 0 : i32
    %c0_i32_1 = arith.constant 0 : i32
    %c0_i32_2 = arith.constant 0 : i32
    return %c0_i32, %c0_i32_0, %c0_i32_1 : i32, i32, i32
  }
  func.func @transform_15(%arg0: i32) -> (i32, i32, i32) {
    %c0_i32 = arith.constant 0 : i32
    %c0_i32_0 = arith.constant 0 : i32
    %c0_i32_1 = arith.constant 0 : i32
    %c0_i32_2 = arith.constant 0 : i32
    return %c0_i32, %c0_i32_0, %c0_i32_1 : i32, i32, i32
  }
  func.func @transform_16(%arg0: i32) -> (i32, i32) {
    %c0_i32 = arith.constant 0 : i32
    %c0_i32_0 = arith.constant 0 : i32
    %c0_i32_1 = arith.constant 0 : i32
    return %c0_i32, %c0_i32_0 : i32, i32
  }
  func.func @transform_17(%arg0: i32) -> (i32, i32) {
    %c0_i32 = arith.constant 0 : i32
    %c0_i32_0 = arith.constant 0 : i32
    %c0_i32_1 = arith.constant 0 : i32
    return %c0_i32, %c0_i32_0 : i32, i32
  }
  func.func @transform_18(%arg0: i32) -> (i32, i32) {
    %c0_i32 = arith.constant 0 : i32
    %c0_i32_0 = arith.constant 0 : i32
    %c0_i32_1 = arith.constant 0 : i32
    return %c0_i32, %c0_i32_0 : i32, i32
  }
  func.func @transform_19(%arg0: i32) -> (i32, i32) {
    %c0_i32 = arith.constant 0 : i32
    %c0_i32_0 = arith.constant 0 : i32
    %c0_i32_1 = arith.constant 0 : i32
    return %c0_i32, %c0_i32_0 : i32, i32
  }
  func.func @transform_20(%arg0: i32) -> (i32, i32, i32) {
    %c0_i32 = arith.constant 0 : i32
    %c0_i32_0 = arith.constant 0 : i32
    %c0_i32_1 = arith.constant 0 : i32
    return %arg0, %c0_i32, %c0_i32_0 : i32, i32, i32
  }
}

</mosaic_0001>

<bundles_post_ra>
// kernel: bert_asc_forward.1
= control target key start
LH: loop header
LB: loop body
LE: loop exit
PB: predicated region body
PF: predicated region fallthrough
CT: control target
= control target key end

     0   :  { %s3626_s0 = inlined_call_operand.vmem [shape: f32[2,8,32], index: 0, kind: input, shape index: {}]   ;;  %s3627_s1 = inlined_call_operand.vmem [shape: f32[2,1,8], index: 1, kind: input, shape index: {}]   ;;  %s3628_s2 = inlined_call_operand.vmem [shape: f32[1,32], index: 2, kind: input, shape index: {}]   ;;  %s3629_s3 = inlined_call_operand.vmem [shape: f32[1,32], index: 3, kind: input, shape index: {}]   ;;  %s3630_s4 = inlined_call_operand.vmem [shape: f32[2,32,96], index: 4, kind: input, shape index: {}]   ;;  %s3631_s5 = inlined_call_operand.vmem [shape: f32[2,1,96], index: 5, kind: input, shape index: {}]   ;;  %s3632_s6 = inlined_call_operand.vmem [shape: f32[2,32,32], index: 6, kind: input, shape index: {}]   ;;  %s3633_s7 = inlined_call_operand.vmem [shape: f32[2,1,32], index: 7, kind: input, shape index: {}]   ;;  %s3634_s8 = inlined_call_operand.vmem [shape: f32[2,1,32], index: 8, kind: input, shape index: {}]   ;;  %s3635_s9 = inlined_call_operand.vmem [shape: f32[2,1,32], index: 9, kind: input, shape index: {}]   ;;  %s3636_s10 = inlined_call_operand.vmem [shape: f32[2,32,64], index: 10, kind: input, shape index: {}]   ;;  %s3637_s11 = inlined_call_operand.vmem [shape: f32[2,1,64], index: 11, kind: input, shape index: {}]   ;;  %s3638_s12 = inlined_call_operand.vmem [shape: f32[2,64,32], index: 12, kind: input, shape index: {}]   ;;  %s3639_s13 = inlined_call_operand.vmem [shape: f32[2,1,32], index: 13, kind: input, shape index: {}]   ;;  %s3640_s14 = inlined_call_operand.vmem [shape: f32[2,1,32], index: 14, kind: input, shape index: {}]   ;;  %s3641_s15 = inlined_call_operand.vmem [shape: f32[2,1,32], index: 15, kind: input, shape index: {}]   ;;  %s3642_s16 = inlined_call_operand.vmem [shape: f32[32,32], index: 16, kind: input, shape index: {}]   ;;  %s3643_s17 = inlined_call_operand.vmem [shape: f32[1,32], index: 17, kind: input, shape index: {}]   ;;  %s3644_s18 = inlined_call_operand.vmem [shape: f32[32,3], index: 18, kind: input, shape index: {}]   ;;  %s3645_s19 = inlined_call_operand.vmem [shape: f32[1,3], index: 19, kind: input, shape index: {}]   ;;  %s3646_s20 = inlined_call_operand.hbm [shape: f32[2,1,3], index: 20, kind: output, shape index: {}]  }
   0x1   :  { %3658 = sst [smem:[#allocation10_spill]] %s3626_s0 }
   0x2   :  { %3659 = sst [smem:[#allocation11_spill]] %s3627_s1 }
   0x3   :  { %3660 = sst [smem:[#allocation12_spill]] %s3628_s2 }
   0x4   :  { %3661 = sst [smem:[#allocation13_spill]] %s3629_s3 }
   0x5   :  { %3662 = sst [smem:[#allocation14_spill]] %s3630_s4 }
   0x6   :  { %25 = vsyncpa [#allocation3], 0 }
   0x7   :  { %27 = vsyncpa [#allocation3 + $0x1], 0  ;;  %s3175_s1 = smov 0   ;;  %s3177_s22 = smov 0  }
   0x8   :  { %s3179_s23 = smov 0   ;;  %s3181_s24 = smov 0  }
   0x9 LB: > { %3663 = sst [smem:[#allocation5_spill]] %s3047_s1  ;;  %s3196_s2 = sadd.s32 4294967295, %s3059_s24   ;;  %s3059_s24 = sphi %s3181_s24, %s3681_s24   ;;  %s3055_s23 = sphi %s3179_s23, %s3686_s23   ;;  %s3051_s22 = sphi %s3177_s22, %s3685_s22   ;;  %s3047_s1 = sphi %s3175_s1, %s3684_s1  }
   0xa   : > { %3664 = sst [smem:[#allocation6_spill]] %s3055_s23  ;;  %s2523_s25 = sadd.s32 4294967294, %s3059_s24  }
   0xb   : > { %s3200_s3 = sadd.s32 1, %s3059_s24   ;;  %s470_s26 = sadd.s32 1, %s3055_s23 }
   0xc   : > { %3665 = sst [smem:[#allocation7_spill]] %s3200_s3  ;;  %s467_s27 = ssub.s32 %s3059_s24, %s3200_s3 }
   0xd   : > { %p480_p0 = scmp.ne.s32.totalorder %s3055_s23, %s3051_s22  ;;  %p468_p1 = scmp.eq.s32.totalorder %s467_s27, 0 }
   0xe   : > { %p481_p2 = scmp.eq.s32.totalorder %s3196_s2, 1  ;;  %p486_p3 = scmp.ne.s32.totalorder %s3051_s22, %s3047_s1 }
   0xf   : > { %p487_p4 = scmp.eq.s32.totalorder %s2523_s25, 1  ;;  %p2526_p7 = scmp.ge.s32.totalorder %s3059_s24, 1 }
  0x10   : > { %s3211_s28 = scalar_select %p468_p1, %s3055_s23, %s470_s26  }
  0x11   : > { %p3213_p5 = por %p481_p2, %p480_p0  ;;  %p3217_p6 = por %p487_p4, %p486_p3 }
  0x12   : > { %3666 = sst [smem:[#allocation8_spill]] %s3211_s28  ;;  %p572_p8 = scmp.lt.s32.totalorder %s3059_s24, 3 }
  0x13   : > { %s3668_s29 = scalar_select %p3217_p6, 1, 0 }
  0x14   : > { %p573_p9 = pnand %p2526_p7, %p572_p8 }
  0x15   : > { %3669 = sst [smem:[#allocation9_spill]] %s3668_s29  ;;  %p631_p10 = scmp.lt.s32.totalorder (!%p573_p9), %s3196_s2, 1  ;;  %vm642_vm0 = vcmask (!%p573_p9), 261120   ;;  %v3061_v10 = vmov (!%p573_p9), 0.0|0.0   ;;  %vm3062_vm1 = vmmov (!%p573_p9), 0   ;;  %v3063_v13 = vmov (!%p573_p9), 0.0  }
  0x16   : > { %576 = sbr.rel (%p573_p9) target bundleno = 6392 (0x18f8), region = 100  ;;  %s3670_s26 = sld [smem:[#allocation10_spill]] (!%p573_p9)  ;;  %2842 = vmatprep.subr.bf16.mxu0 (!%p573_p9), %v3061_v10  ;;  %2678 = vmatprep.mubr.msk.f32.mxu0 (!%p573_p9), %vm3062_vm1, %v3063_v13  ;;  %v2530_v24 = vld [vmem:[%s3631_s5] ss:$0 sm:$0xff] (!%p573_p9)  ;;  %vm768_vm2 = vcmask (!%p573_p9), 130048   ;;  %v760_v30 = vlaneseq (!%p573_p9)  ;;  %vm843_vm3 = vcmask (!%p573_p9), 64512  }
  0x17   : > { %s3671_s3 = sld [smem:[#allocation14_spill]] (!%p573_p9)  ;;  %2681 = vmatprep.subr.mxu1 (!%p573_p9), %v3063_v13  ;;  %2683 = vmatprep.mubr.msk.f32.mxu1 (!%p573_p9), %vm3062_vm1, %v3063_v13  ;;  %s3672_s28 = sld [smem:[#allocation12_spill]] (!%p573_p9)  ;;  %v757_v61 = vld [vmem:[%s3632_s6 + $0x10] sm:$0xff] (!%p573_p9)  ;;  %v758_v62 = vld [vmem:[%s3632_s6 + $0x18] sm:$0xff] (!%p573_p9)  ;;  %vm1388_vm4 = vcmask (!%p573_p9), 523264   ;;  %vm1660_vm5 = vcmask (!%p573_p9), 57344  }
  0x18   : > { %s3656_s1 = smov (!%p573_p9), 96   ;;  %s3066_s23 = smov (!%p573_p9), 80   ;;  %v761_v31 = vshrl.u32 (!%p573_p9), %v760_v30, 7  ;;  %v2849_v63 = vpack.c.bf16 (!%p573_p9), %v758_v62, %v757_v61  ;;  %vm2067_vm6 = vcmask (!%p573_p9), 253952   ;;  %vm2433_vm7 = vcmask (!%p573_p9), 16384  }
  0x19   : > { %s3654_s21 = smov (!%p573_p9), 48   ;;  %s3676_s29 = smov (!%p573_p9), 112  }
  0x1a   : > { %v762_v32 = vsub.s32 (!%p573_p9), 0, %v761_v31 }
  0x1d   : > { %s3225_s30 = scalar_select %p631_p10, %s3196_s2, 1  ;;  %v671_v7 = vld [vmem:[%s3671_s3] sm:$0xff]  ;;  %v672_v8 = vld [vmem:[%s3671_s3 + $0x8] sm:$0xff]  ;;  %v673_v9 = vld [vmem:[%s3671_s3 + $0x10] sm:$0xff] }
  0x1e   : > { %v2843_v11 = vpack.c.bf16 %v672_v8, %v671_v7  ;;  %v674_v12 = vld [vmem:[%s3671_s3 + $0x18] sm:$0xff]  ;;  %v2528_v19 = vld [vmem:[%s3672_s28] ss:$0 sm:$0xff] }
  0x1f   : > { %s2527_s0 = sshll.u32 %s3225_s30, 3  ;;  %v2846_v14 = vpack.c.bf16 %v674_v12, %v673_v9 }
  0x20   : > { %s634_s27 = scalar_lea.vmem %s3670_s26, %s2527_s0  ;;  %2844 = vmatpush3.bf16.msra.mxu0 %v2843_v11  ;;  %s3673_s0 = sld [smem:[#allocation13_spill]] }
  0x21   : > { %v638_v0 = vld [vmem:[%s634_s27] sm:$0xff]  ;;  %2845 = vmatprep.subr.bf16.mxu0 %v3061_v10  ;;  %s3653_s26 = smov 64   ;;  %s3674_s27 = sld [smem:[#allocation11_spill]] }
  0x22   : > { %v643_v1 = vsel %vm642_vm0, %v638_v0, 0.0 }
  0x23   : > { %644 = vadd.xlane.f32.xlu0 %v643_v1  ;;  %v755_v1 = vld [vmem:[%s3632_s6] sm:$0xff] }
  0x24   : > { %2847 = vmatpush3.bf16.msra.mxu0 %v2846_v14 }
  0x25   : > { %2848 = vmatprep.subr.bf16.mxu0 %v3061_v10 }
  0x26   : > { %v2529_v21 = vld [vmem:[%s3673_s0] ss:$0 sm:$0xff] }
  0x27   : > { %s637_s0 = scalar_lea.vmem %s3674_s27, %s3225_s30  ;;  %s3655_s30 = smov 112  }
  0x28   : > { %v3281_v33 = vld [vmem:[%s637_s0] sm:$0x1]  ;;  %s3678_s27 = smov 64  }
  0x29   : > { %v763_v34 = vrot.slane %v3281_v33, %v762_v32 }
  0xb0   : > { %v645_v2 = vpop.xlane.xlu0 %644 }
  0xb1   : > { %v647_v3 = vmul.f32 0.03125, %v645_v2  ;;  %v756_v2 = vld [vmem:[%s3632_s6 + $0x8] sm:$0xff] }
  0xb3   : > { %v648_v4 = vsub.f32 %v638_v0, %v647_v3 }
  0xb5   : > { %v649_v5 = vmul.f32 %v648_v4, %v648_v4 }
  0xb7   : > { %v650_v6 = vsel %vm642_vm0, %v649_v5, 0.0 }
  0xb8   : > { %651 = vadd.xlane.f32.xlu0 %v650_v6 }
 0x145   : > { %v652_v15 = vpop.xlane.xlu0 %651 }
 0x146   : > { %v653_v16 = vmul.f32 0.03125, %v652_v15  ;;  %v2540_v15 = vld [vmem:[%s3633_s7] ss:$0 sm:$0xff] }
 0x148   : > { %v654_v17 = vadd.f32 1e-12, %v653_v16 }
 0x14a   : > { %2961 = vrsqrt.f32 %v654_v17 }
 0x154   : > { %v2962_v18 = vpop.eup %2961 }
 0x155   : > { %v656_v20 = vmul.f32 %v2962_v18, %v648_v4  ;;  %v2852_v4 = vpack.c.bf16 %v756_v2, %v755_v1  ;;  %v2545_v1 = vld [vmem:[%s3639_s13] ss:$0 sm:$0xff] }
 0x157   : > { %v663_v22 = vmul.f32 %v2528_v19, %v656_v20 }
 0x159   : > { %v3259_v23 = vadd.f32 %v2529_v21, %v663_v22 }
 0x15b   : > { %2679 = vmatmul.mubr.msk.f32.vlgmr.msra.gmra.mrb[0].mxu0 %vm642_vm0, %v3259_v23 }
 0x15c   : > { %2705 = vmatprep.mubr.msk.f32.mxu0 %vm3062_vm1, %v3063_v13  ;;  %2850 = vmatpush3.bf16.msra.mxu0 %v2849_v63 }
 0x15d   : > { %2854 = vmatprep.subr.bf16.mxu0 %v3061_v10 }
 0x22e   : > { %v751_v25 = vpop.f32.mrb[0].mxu0 }
 0x22f   : > { %v752_v26 = vadd.f32 %v2530_v24, %v751_v25  ;;  %v2680_v27 = vpop.f32.mrb[1].mxu0  ;;  %v1280_v25 = vld [vmem:[%s3636_s10] sm:$0xff] }
 0x230   : > { %v1282_v27 = vld [vmem:[%s3636_s10 + $0x10] sm:$0xff] }
 0x231   : > { %855 = vrot.lane.b32.xlu0 %v752_v26, %s3653_s26  ;;  %766 = vrot.lane.b32.xlu1 %v752_v26, %s3656_s1  ;;  %s3675_s1 = smov 96  }
 0x235   : > { %933 = vrot.lane.b32.xlu0 %v752_v26, %s3066_s23 }
 0x2a3   : > { %v767_v28 = vpop.permute.xlu1 %766  ;;  %v856_v29 = vpop.permute.xlu0 %855 }
 0x2a4   : > { %2682 = vmatpush3.xpose.msk.msra.mxu1 %vm768_vm2, %v767_v28  ;;  %v1283_v28 = vld [vmem:[%s3636_s10 + $0x18] sm:$0xff] }
 0x2a5   : > { %2686 = vmatprep.subr.mxu1 %v3063_v13 }
 0x2a7   : > { %2684 = vmatmul.mubr.msk.f32.vlgmr.msra.gmra.mrb[0].mxu1 %vm768_vm2, %v752_v26  ;;  %v934_v44 = vpop.permute.xlu0 %933 }
 0x2a8   : > { %2687 = vmatpush3.msra.mxu1 %v856_v29  ;;  %2688 = vmatprep.mubr.msk.f32.mxu1 %vm3062_vm1, %v3063_v13  ;;  %v2858_v29 = vpack.c.bf16 %v1283_v28, %v1282_v27 }
 0x2a9   : > { %2691 = vmatprep.subr.mxu1 %v3063_v13 }
 0x37a   : > { %v839_v35 = vpop.f32.mrb[0].mxu1 }
 0x37b   : > { %v840_v36 = vadd.f32 %v839_v35, %v763_v34  ;;  %v2685_v37 = vpop.f32.mrb[1].mxu1  ;;  %v2541_v35 = vld [vmem:[%s3634_s8] ss:$0 sm:$0xff] }
 0x37c   : > { %v2542_v37 = vld [vmem:[%s3635_s9] ss:$0 sm:$0xff] }
 0x37d   : > { %v844_v38 = vsel %vm843_vm3, %v840_v36, -inf }
 0x37e   : > { %845 = vmax.xlane.f32.xlu1 %v844_v38 }
 0x40b   : > { %v846_v39 = vpop.xlane.xlu1 %845 }
 0x40c   : > { %v847_v40 = vsub.f32 %v840_v36, %v846_v39 }
 0x40e   : > { %v848_v41 = vmul.f32 1.442695, %v847_v40  ;;  %v1373_v40 = vld [vmem:[%s3638_s12] sm:$0xff] }
 0x410   : > { %2963 = vpow2.f32 %v848_v41  ;;  %v1374_v41 = vld [vmem:[%s3638_s12 + $0x8] sm:$0xff] }
 0x41a   : > { %v2964_v42 = vpop.eup %2963 }
 0x41b   : > { %v850_v43 = vsel %vm843_vm3, %v2964_v42, 0.0 }
 0x41c   : > { %851 = vadd.xlane.f32.xlu0 %v850_v43  ;;  %v1375_v43 = vld [vmem:[%s3638_s12 + $0x10] sm:$0xff] }
 0x432   : > { %931 = vrot.lane.b32.xlu0 %v752_v26, %s3655_s30 }
 0x4a9   : > { %v852_v45 = vpop.xlane.xlu0 %851 }
 0x4aa   : > { %2965 = vrcp.f32 %v852_v45 }
 0x4ad   : > { %v932_v48 = vpop.permute.xlu0 %931 }
 0x4b4   : > { %v2966_v46 = vpop.eup %2965 }
 0x4b5   : > { %v854_v47 = vmul.f32 %v2966_v46, %v2964_v42  ;;  %v2861_v42 = vpack.c.bf16 %v1374_v41, %v1373_v40  ;;  %v1377_v46 = vld [vmem:[%s3638_s12 + $0x20] sm:$0xff] }
 0x4b7   : > { %2689 = vmatmul.mubr.msk.f32.vlgmr.msra.gmra.mrb[2].mxu1 %vm843_vm3, %v854_v47  ;;  %v1378_v47 = vld [vmem:[%s3638_s12 + $0x28] sm:$0xff] }
 0x4b8   : > { %2692 = vmatpush3.xpose.msk.msra.mxu1 %vm768_vm2, %v934_v44  ;;  %2693 = vmatprep.mubr.msk.f32.mxu1 %vm3062_vm1, %v3063_v13  ;;  %v1376_v44 = vld [vmem:[%s3638_s12 + $0x18] sm:$0xff] }
 0x4b9   : > { %2696 = vmatprep.subr.mxu1 %v3063_v13  ;;  %v2864_v45 = vpack.c.bf16 %v1376_v44, %v1375_v43 }
 0x4bb   : > { %2694 = vmatmul.mubr.msk.f32.vlgmr.msra.gmra.mrb[4].mxu1 %vm768_vm2, %v932_v48  ;;  %v2867_v48 = vpack.c.bf16 %v1378_v47, %v1377_v46 }
 0x4bc   : > { %2698 = vmatprep.mubr.msk.f32.mxu1 %vm3062_vm1, %v3063_v13 }
 0x58a   : > { %v927_v49 = vpop.f32.mrb[2].mxu1 }
 0x58b   : > { %v2690_v50 = vpop.f32.mrb[3].mxu1 }
 0x58c   : > { %v1380_v50 = vld [vmem:[%s3638_s12 + $0x38] sm:$0xff] }
 0x58e   : > { %v1005_v51 = vpop.f32.mrb[4].mxu1 }
 0x58f   : > { %v1006_v52 = vadd.f32 %v1005_v51, %v763_v34  ;;  %v2695_v53 = vpop.f32.mrb[5].mxu1 }
 0x591   : > { %v1009_v54 = vsel %vm843_vm3, %v1006_v52, -inf }
 0x592   : > { %1010 = vmax.xlane.f32.xlu1 %v1009_v54 }
 0x5a3   : > { %1020 = vrot.lane.b32.xlu1 %v752_v26, %s3654_s21  ;;  %v1281_v26 = vld [vmem:[%s3636_s10 + $0x8] sm:$0xff] }
 0x61f   : > { %v1011_v55 = vpop.xlane.xlu1 %1010 }
 0x620   : > { %v1012_v56 = vsub.f32 %v1006_v52, %v1011_v55  ;;  %v2543_v52 = vld [vmem:[%s3637_s11] ss:$0 sm:$0xff] }
 0x622   : > { %v1013_v57 = vmul.f32 1.442695, %v1012_v56 }
 0x623   : > { %v1021_v58 = vpop.permute.xlu1 %1020 }
 0x624   : > { %2967 = vpow2.f32 %v1013_v57  ;;  %2697 = vmatpush3.msra.mxu1 %v1021_v58 }
 0x625   : > { %2851 = vmatprep.subr.bf16.mxu1 %v3061_v10 }
 0x62e   : > { %v2968_v59 = vpop.eup %2967 }
 0x62f   : > { %v1015_v60 = vsel %vm843_vm3, %v2968_v59, 0.0 }
 0x630   : > { %1016 = vadd.xlane.f32.xlu0 %v1015_v60 }
 0x6bd   : > { %v1017_v0 = vpop.xlane.xlu0 %1016 }
 0x6be   : > { %2969 = vrcp.f32 %v1017_v0 }
 0x6c8   : > { %v2970_v3 = vpop.eup %2969 }
 0x6c9   : > { %v1019_v5 = vmul.f32 %v2970_v3, %v2968_v59 }
 0x6cb   : > { %2699 = vmatmul.mubr.msk.f32.vlgmr.msra.gmra.mrb[6].mxu1 %vm843_vm3, %v1019_v5 }
 0x6cc   : > { %2853 = vmatpush3.bf16.msra.mxu1 %v2852_v4  ;;  %2712 = vmatprep.mubr.msk.f32.mxu1 %vm3062_vm1, %v3063_v13 }
 0x6cd   : > { %2860 = vmatprep.subr.bf16.mxu1 %v3061_v10 }
 0x6cf   : > { %2713 = vmatmul.mubr.msk.f32.vlgmr.msra.gmra.mrb[8].mxu1 %vm768_vm2, %v927_v49  ;;  %v1379_v49 = vld [vmem:[%s3638_s12 + $0x30] sm:$0xff] }
 0x6d0   : > { %2742 = vmatprep.mubr.msk.f32.mxu1 %vm3062_vm1, %v3063_v13  ;;  %2862 = vmatpush3.bf16.msra.mxu1 %v2861_v42  ;;  %v2870_v51 = vpack.c.bf16 %v1380_v50, %v1379_v49 }
 0x6d1   : > { %2863 = vmatprep.subr.bf16.mxu1 %v3061_v10 }
 0x6d4   : > { %2865 = vmatpush3.bf16.msra.mxu1 %v2864_v45 }
 0x6d5   : > { %2866 = vmatprep.subr.bf16.mxu1 %v3061_v10 }
 0x6d8   : > { %2868 = vmatpush3.bf16.msra.mxu1 %v2867_v48 }
 0x6d9   : > { %2869 = vmatprep.subr.bf16.mxu1 %v3061_v10 }
 0x6dc   : > { %2871 = vmatpush3.bf16.msra.mxu1 %v2870_v51 }
 0x6dd   : > { %2761 = vmatprep.subr.mxu1 %v3063_v13 }
 0x79e   : > { %v1092_v6 = vpop.f32.mrb[6].mxu1 }
 0x79f   : > { %v2700_v7 = vpop.f32.mrb[7].mxu1  ;;  %2706 = vmatmul.mubr.msk.f32.vlgmr.msra.gmra.mrb[2].mxu0 %vm768_vm2, %v1092_v6 }
 0x7a0   : > { %2723 = vmatprep.mubr.msk.f32.mxu0 %vm3062_vm1, %v3063_v13 }
 0x7a2   : > { %v1238_v8 = vpop.f32.mrb[8].mxu1 }
 0x7a3   : > { %v2714_v9 = vpop.f32.mrb[9].mxu1 }
 0x872   : > { %v1165_v11 = vpop.f32.mrb[2].mxu0 }
 0x873   : > { %v1239_v12 = vadd.f32 %v1238_v8, %v1165_v11  ;;  %v2707_v14 = vpop.f32.mrb[3].mxu0 }
 0x874   : > { %v2549_v14 = vld [vmem:[%s3671_s3 + $0x20] sm:$0xff] }
 0x875   : > { %v1242_v16 = vadd.f32 %v1239_v12, %v3259_v23  ;;  %v2855_v23 = vpack.c.bf16 %v1281_v26, %v1280_v25  ;;  %v2547_v25 = vld [vmem:[%s3640_s14] ss:$0 sm:$0xff] }
 0x877   : > { %v1250_v17 = vadd.f32 %v2540_v15, %v1242_v16  ;;  %2856 = vmatpush3.bf16.msra.mxu0 %v2855_v23  ;;  %v2550_v15 = vld [vmem:[%s3671_s3 + $0x28] sm:$0xff]  ;;  %v2548_v23 = vld [vmem:[%s3641_s15] ss:$0 sm:$0xff] }
 0x878   : > { %2857 = vmatprep.subr.bf16.mxu0 %v3061_v10  ;;  %v2873_v16 = vpack.c.bf16 %v2550_v15, %v2549_v14  ;;  %v2568_v15 = vld [vmem:[%s3633_s7 + $0x1] sm:$0x1] }
 0x879   : > { %v1253_v18 = vsel %vm642_vm0, %v1250_v17, 0.0 }
 0x87a   : > { %1254 = vadd.xlane.f32.xlu1 %v1253_v18  ;;  %v2552_v18 = vld [vmem:[%s3671_s3 + $0x38] sm:$0xff] }
 0x87b   : > { %2859 = vmatpush3.bf16.msra.mxu0 %v2858_v29  ;;  %v2554_v29 = vld [vmem:[%s3631_s5 + $0x1] ss:$0 sm:$0xff] }
 0x87c   : > { %2872 = vmatprep.subr.bf16.mxu0 %v3061_v10 }
 0x907   : > { %v1255_v19 = vpop.xlane.xlu1 %1254 }
 0x908   : > { %v1256_v20 = vmul.f32 0.03125, %v1255_v19 }
 0x90a   : > { %v1257_v21 = vsub.f32 %v1250_v17, %v1256_v20  ;;  %v2551_v17 = vld [vmem:[%s3671_s3 + $0x30] sm:$0xff] }
 0x90b   : > { %v2876_v19 = vpack.c.bf16 %v2552_v18, %v2551_v17 }
 0x90c   : > { %v1258_v22 = vmul.f32 %v1257_v21, %v1257_v21 }
 0x90e   : > { %v1259_v24 = vsel %vm642_vm0, %v1258_v22, 0.0 }
 0x90f   : > { %1260 = vadd.xlane.f32.xlu0 %v1259_v24 }
 0x99c   : > { %v1261_v30 = vpop.xlane.xlu0 %1260 }
 0x99d   : > { %v1262_v31 = vmul.f32 0.03125, %v1261_v30 }
 0x99f   : > { %v1263_v32 = vadd.f32 1e-12, %v1262_v31 }
 0x9a1   : > { %2971 = vrsqrt.f32 %v1263_v32 }
 0x9ab   : > { %v2972_v34 = vpop.eup %2971 }
 0x9ac   : > { %v1265_v36 = vmul.f32 %v2972_v34, %v1257_v21 }
 0x9ae   : > { %v1272_v38 = vmul.f32 %v2541_v35, %v1265_v36 }
 0x9b0   : > { %v1279_v39 = vadd.f32 %v2542_v37, %v1272_v38 }
 0x9b2   : > { %2724 = vmatmul.mubr.msk.f32.vlgmr.msra.gmra.mrb[4].mxu0 %vm642_vm0, %v1279_v39 }
 0x9b3   : > { %2753 = vmatprep.mubr.msk.f32.mxu0 %vm3062_vm1, %v3063_v13  ;;  %2874 = vmatpush3.bf16.msra.mxu0 %v2873_v16 }
 0x9b4   : > { %2875 = vmatprep.subr.bf16.mxu0 %v3061_v10 }
 0x9b7   : > { %2877 = vmatpush3.bf16.msra.mxu0 %v2876_v19 }
 0x9b8   : > { %2756 = vmatprep.subr.mxu0 %v3063_v13 }
 0xa85   : > { %v1360_v53 = vpop.f32.mrb[4].mxu0 }
 0xa86   : > { %v1361_v54 = vadd.f32 %v2543_v52, %v1360_v53  ;;  %v2725_v55 = vpop.f32.mrb[5].mxu0 }
 0xa88   : > { %v1365_v56 = vmul.f32 0.044715, %v1361_v54  ;;  %v1364_v62 = vmul.f32 0.5, %v1361_v54 }
 0xa8a   : > { %v1366_v57 = vmul.f32 %v1365_v56, %v1361_v54 }
 0xa8c   : > { %v1367_v58 = vmul.f32 %v1366_v57, %v1361_v54 }
 0xa8e   : > { %v1368_v59 = vadd.f32 %v1367_v58, %v1361_v54 }
 0xa90   : > { %v1369_v60 = vmul.f32 0.7978846, %v1368_v59  ;;  %v2556_v59 = vld [vmem:[%s3632_s6 + $0x20] sm:$0xff] }
 0xa92   : > { %2973 = vtanh.f32 %v1369_v60  ;;  %v2557_v60 = vld [vmem:[%s3632_s6 + $0x28] sm:$0xff] }
 0xa9c   : > { %v2974_v61 = vpop.eup %2973 }
 0xa9d   : > { %v1371_v63 = vadd.f32 1.0, %v2974_v61 }
 0xa9f   : > { %v1372_v0 = vmul.f32 %v1371_v63, %v1364_v62  ;;  %v2882_v63 = vpack.c.bf16 %v2557_v60, %v2556_v59 }
 0xaa1   : > { %2743 = vmatmul.mubr.msk.f32.vlgmr.msra.gmra.mrb[10].mxu1 %vm1388_vm4, %v1372_v0 }
 0xaa2   : > { %2763 = vmatprep.mubr.msk.f32.mxu1 %vm3062_vm1, %v3063_v13 }
 0xb74   : > { %v1458_v2 = vpop.f32.mrb[10].mxu1 }
 0xb75   : > { %v1459_v3 = vadd.f32 %v2545_v1, %v1458_v2  ;;  %v2744_v4 = vpop.f32.mrb[11].mxu1  ;;  %v2558_v1 = vld [vmem:[%s3632_s6 + $0x30] sm:$0xff]  ;;  %v2559_v2 = vld [vmem:[%s3632_s6 + $0x38] sm:$0xff] }
 0xb77   : > { %v1462_v5 = vadd.f32 %v1459_v3, %v1279_v39  ;;  %v2879_v3 = vpack.c.bf16 %v2559_v2, %v2558_v1 }
 0xb79   : > { %v1465_v6 = vsel %vm642_vm0, %v1462_v5, 0.0 }
 0xb7a   : > { %1466 = vadd.xlane.f32.xlu0 %v1465_v6 }
 0xc07   : > { %v1467_v7 = vpop.xlane.xlu0 %1466 }
 0xc08   : > { %v1468_v8 = vmul.f32 0.03125, %v1467_v7 }
 0xc0a   : > { %v1469_v9 = vsub.f32 %v1462_v5, %v1468_v8 }
 0xc0c   : > { %v1470_v11 = vmul.f32 %v1469_v9, %v1469_v9 }
 0xc0e   : > { %v1471_v12 = vsel %vm642_vm0, %v1470_v11, 0.0 }
 0xc0f   : > { %1472 = vadd.xlane.f32.xlu0 %v1471_v12 }
 0xc9c   : > { %v1473_v20 = vpop.xlane.xlu0 %1472 }
 0xc9d   : > { %v1474_v21 = vmul.f32 0.03125, %v1473_v20 }
 0xc9f   : > { %v1475_v22 = vadd.f32 1e-12, %v1474_v21 }
 0xca1   : > { %2975 = vrsqrt.f32 %v1475_v22 }
 0xcab   : > { %v2976_v24 = vpop.eup %2975 }
 0xcac   : > { %v1477_v26 = vmul.f32 %v2976_v24, %v1469_v9 }
 0xcae   : > { %v1484_v27 = vmul.f32 %v2547_v25, %v1477_v26  ;;  %v2571_v25 = vld [vmem:[%s3636_s10 + $0x20] sm:$0xff]  ;;  %v2572_v26 = vld [vmem:[%s3636_s10 + $0x28] sm:$0xff] }
 0xcb0   : > { %v3410_v28 = vadd.f32 %v2548_v23, %v1484_v27  ;;  %v2885_v23 = vpack.c.bf16 %v2572_v26, %v2571_v25  ;;  %v2573_v27 = vld [vmem:[%s3636_s10 + $0x30] sm:$0xff]  ;;  %v2588_v26 = vld [vmem:[%s3641_s15 + $0x1] sm:$0x1] }
 0xcb2   : > { %2754 = vmatmul.mubr.msk.f32.vlgmr.msra.gmra.mrb[6].mxu0 %vm642_vm0, %v3410_v28 }
 0xcb3   : > { %2758 = vmatprep.mubr.msk.f32.mxu0 %vm3062_vm1, %v3063_v13 }
 0xd85   : > { %v1574_v30 = vpop.f32.mrb[6].mxu0 }
 0xd86   : > { %v1575_v31 = vadd.f32 %v2554_v29, %v1574_v30  ;;  %v2755_v32 = vpop.f32.mrb[7].mxu0 }
 0xd88   : > { %1750 = vrot.lane.b32.xlu1 %v1575_v31, %s3066_s23  ;;  %1584 = vrot.lane.b32.xlu0 %v1575_v31, %s3675_s1  ;;  %s3677_s23 = smov 48   ;;  %s629_s1 = sand.u32 1, %s3051_s22  }
 0xd89   : > { %s2447_s21 = scalar_lea.sflag [#allocation3], %s629_s1 }
 0xd8c   : > { %1748 = vrot.lane.b32.xlu0 %v1575_v31, %s3676_s29  ;;  %s2591_s29 = sshll.u32 %s3196_s2, 4  ;;  %s3069_s2 = smov [#allocation2]  }
 0xd8d   : > { %s3583_s30 = scalar_lea.hbm %s3646_s20, %s2591_s29  ;;  %s3001_s28 = sshll.u32 %s3069_s2, 4  ;;  %s3002_s28 = int_to_ptr.vmem [resolvable:$false] %s3001_s28 }
 0xd8e   : > { %s3003_s3 = scalar_lea.vmem %s3002_s28, 32 }
 0xdfa   : > { %v1585_v34 = vpop.permute.xlu0 %1584  ;;  %v1751_v35 = vpop.permute.xlu1 %1750 }
 0xdfb   : > { %2757 = vmatpush3.xpose.msk.msra.mxu0 %vm768_vm2, %v1585_v34 }
 0xdfc   : > { %2766 = vmatprep.subr.mxu0 %v3063_v13 }
 0xdfe   : > { %2759 = vmatmul.mubr.msk.f32.vlgmr.msra.gmra.mrb[8].mxu0 %vm768_vm2, %v1575_v31  ;;  %v1749_v36 = vpop.permute.xlu0 %1748 }
 0xdff   : > { %2767 = vmatpush3.xpose.msk.msra.mxu0 %vm768_vm2, %v1751_v35  ;;  %2768 = vmatprep.mubr.msk.f32.mxu0 %vm3062_vm1, %v3063_v13  ;;  %v2569_v35 = vld [vmem:[%s3634_s8 + $0x1] sm:$0x1] }
 0xe00   : > { %2878 = vmatprep.subr.bf16.mxu0 %v3061_v10 }
 0xe02   : > { %2769 = vmatmul.mubr.msk.f32.vlgmr.msra.gmra.mrb[10].mxu0 %vm768_vm2, %v1749_v36 }
 0xe03   : > { %2780 = vmatprep.mubr.msk.f32.mxu0 %vm3062_vm1, %v3063_v13  ;;  %2880 = vmatpush3.bf16.msra.mxu0 %v2879_v3 }
 0xe04   : > { %2884 = vmatprep.subr.bf16.mxu0 %v3061_v10 }
 0xed1   : > { %v1656_v37 = vpop.f32.mrb[8].mxu0 }
 0xed2   : > { %v1657_v38 = vadd.f32 %v1656_v37, %v3281_v33  ;;  %v2760_v39 = vpop.f32.mrb[9].mxu0  ;;  %v2570_v37 = vld [vmem:[%s3635_s9 + $0x1] sm:$0x1] }
 0xed4   : > { %v1661_v40 = vsel %vm1660_vm5, %v1657_v38, -inf }
 0xed5   : > { %1662 = vmax.xlane.f32.xlu0 %v1661_v40  ;;  %v1822_v41 = vpop.f32.mrb[10].mxu0  ;;  %v2577_v40 = vld [vmem:[%s3638_s12 + $0x40] sm:$0xff] }
 0xed6   : > { %v1823_v42 = vadd.f32 %v1822_v41, %v3281_v33  ;;  %v2770_v43 = vpop.f32.mrb[11].mxu0  ;;  %v2578_v41 = vld [vmem:[%s3638_s12 + $0x48] sm:$0xff] }
 0xed7   : > { %v2579_v43 = vld [vmem:[%s3638_s12 + $0x50] sm:$0xff] }
 0xed8   : > { %v1826_v44 = vsel %vm1660_vm5, %v1823_v42, -inf }
 0xed9   : > { %1827 = vmax.xlane.f32.xlu1 %v1826_v44  ;;  %v2580_v44 = vld [vmem:[%s3638_s12 + $0x58] sm:$0xff] }
 0xeea   : > { %1837 = vrot.lane.b32.xlu1 %v1575_v31, %s3677_s23  ;;  %s630_s23 = scalar_lea.vmem [#allocation2], %s629_s1 }
 0xf62   : > { %v1663_v45 = vpop.xlane.xlu0 %1662 }
 0xf63   : > { %v1664_v46 = vsub.f32 %v1657_v38, %v1663_v45  ;;  %v2894_v45 = vpack.c.bf16 %v2580_v44, %v2579_v43 }
 0xf65   : > { %v1665_v47 = vmul.f32 1.442695, %v1664_v46  ;;  %v2581_v46 = vld [vmem:[%s3638_s12 + $0x60] sm:$0xff] }
 0xf66   : > { %v1828_v48 = vpop.xlane.xlu1 %1827 }
 0xf67   : > { %2977 = vpow2.f32 %v1665_v47  ;;  %v1829_v49 = vsub.f32 %v1823_v42, %v1828_v48  ;;  %v2891_v42 = vpack.c.bf16 %v2578_v41, %v2577_v40  ;;  %v2582_v47 = vld [vmem:[%s3638_s12 + $0x68] sm:$0xff] }
 0xf68   : > { %v2897_v48 = vpack.c.bf16 %v2582_v47, %v2581_v46 }
 0xf69   : > { %v1830_v50 = vmul.f32 1.442695, %v1829_v49  ;;  %v2583_v49 = vld [vmem:[%s3638_s12 + $0x70] sm:$0xff] }
 0xf6a   : > { %v1838_v61 = vpop.permute.xlu1 %1837 }
 0xf6b   : > { %2979 = vpow2.f32 %v1830_v50  ;;  %v2584_v50 = vld [vmem:[%s3638_s12 + $0x78] sm:$0xff] }
 0xf71   : > { %v2978_v51 = vpop.eup %2977 }
 0xf72   : > { %v1667_v52 = vsel %vm1660_vm5, %v2978_v51, 0.0 }
 0xf73   : > { %1668 = vadd.xlane.f32.xlu0 %v1667_v52  ;;  %v2575_v52 = vld [vmem:[%s3637_s11 + $0x1] sm:$0x1] }
 0xf75   : > { %v2980_v53 = vpop.eup %2979 }
 0xf76   : > { %v1832_v33 = vsel %vm1660_vm5, %v2980_v53, 0.0 }
 0xf77   : > { %1833 = vadd.xlane.f32.xlu0 %v1832_v33 }
 0xf8d   : > { %1672 = vrot.lane.b32.xlu0 %v1575_v31, %s3678_s27  ;;  %s2459_s27 = sshll.u32 %s630_s23, 4  ;;  %s3585_s27 = int_to_ptr.vmem [resolvable:$true] %s2459_s27 }
 0xf8e   : > { %s2997_s25 = scalar_lea.vmem %s3585_s27, 16  ;;  %p3004_p0 = scmp.lt.s32.totalorder %s3585_s27, %s3002_s28 }
 0xf8f   : > { %p2998_p11 = scmp.ne.s32.totalorder %s3585_s27, %s2997_s25  ;;  %p3005_p1 = scmp.lt.s32.totalorder %s3003_s3, %s2997_s25 }
 0xf91   : > { %p2999_p12 = pnand %p2998_p11, %p3213_p5  ;;  %p3006_p2 = por %p3005_p1, %p3004_p0 }
 0xf93   : > { %p3000_p13 = pneg %p2999_p12 }
 0xf95   : > { %p3007_p3 = pnand %p3006_p2, %p3000_p13 }
0x1000   : > { %v1669_v54 = vpop.xlane.xlu0 %1668 }
0x1001   : > { %2981 = vrcp.f32 %v1669_v54 }
0x1004   : > { %v1834_v55 = vpop.xlane.xlu0 %1833 }
0x1005   : > { %2983 = vrcp.f32 %v1834_v55 }
0x1008   : > { %v1673_v56 = vpop.permute.xlu0 %1672 }
0x1009   : > { %2762 = vmatpush3.msra.mxu1 %v1673_v56 }
0x100a   : > { %2771 = vmatprep.subr.mxu1 %v3063_v13 }
0x100b   : > { %v2982_v57 = vpop.eup %2981 }
0x100c   : > { %v1671_v58 = vmul.f32 %v2982_v57, %v2978_v51  ;;  %v2900_v51 = vpack.c.bf16 %v2584_v50, %v2583_v49 }
0x100e   : > { %2764 = vmatmul.mubr.msk.f32.vlgmr.msra.gmra.mrb[12].mxu1 %vm843_vm3, %v1671_v58 }
0x100f   : > { %v2984_v62 = vpop.eup %2983  ;;  %2772 = vmatpush3.msra.mxu1 %v1838_v61  ;;  %2773 = vmatprep.mubr.msk.f32.mxu1 %vm3062_vm1, %v3063_v13 }
0x1010   : > { %v1836_v0 = vmul.f32 %v2984_v62, %v2980_v53  ;;  %2881 = vmatprep.subr.bf16.mxu1 %v3061_v10 }
0x1012   : > { %2774 = vmatmul.mubr.msk.f32.vlgmr.msra.gmra.mrb[14].mxu1 %vm843_vm3, %v1836_v0  ;;  %v2585_v0 = vld [vmem:[%s3639_s13 + $0x1] sm:$0x1] }
0x1013   : > { %2883 = vmatpush3.bf16.msra.mxu1 %v2882_v63  ;;  %2787 = vmatprep.mubr.msk.f32.mxu1 %vm3062_vm1, %v3063_v13 }
0x1014   : > { %2890 = vmatprep.subr.bf16.mxu1 %v3061_v10 }
0x10e1   : > { %v1744_v4 = vpop.f32.mrb[12].mxu1 }
0x10e2   : > { %v2765_v5 = vpop.f32.mrb[13].mxu1  ;;  %2788 = vmatmul.mubr.msk.f32.vlgmr.msra.gmra.mrb[16].mxu1 %vm768_vm2, %v1744_v4 }
0x10e3   : > { %2817 = vmatprep.mubr.msk.f32.mxu1 %vm3062_vm1, %v3063_v13  ;;  %2892 = vmatpush3.bf16.msra.mxu1 %v2891_v42 }
0x10e4   : > { %2893 = vmatprep.subr.bf16.mxu1 %v3061_v10 }
0x10e5   : > { %v1909_v6 = vpop.f32.mrb[14].mxu1 }
0x10e6   : > { %v2775_v7 = vpop.f32.mrb[15].mxu1  ;;  %2781 = vmatmul.mubr.msk.f32.vlgmr.msra.gmra.mrb[12].mxu0 %vm768_vm2, %v1909_v6 }
0x10e7   : > { %2798 = vmatprep.mubr.msk.f32.mxu0 %vm3062_vm1, %v3063_v13  ;;  %2886 = vmatpush3.bf16.msra.mxu0 %v2885_v23 }
0x10e8   : > { %2887 = vmatprep.subr.bf16.mxu0 %v3061_v10  ;;  %2895 = vmatpush3.bf16.msra.mxu1 %v2894_v45 }
0x10e9   : > { %2896 = vmatprep.subr.bf16.mxu1 %v3061_v10 }
0x10ec   : > { %2898 = vmatpush3.bf16.msra.mxu1 %v2897_v48 }
0x10ed   : > { %2899 = vmatprep.subr.bf16.mxu1 %v3061_v10 }
0x10f0   : > { %2901 = vmatpush3.bf16.msra.mxu1 %v2900_v51 }
0x11b5   : > { %v2055_v8 = vpop.f32.mrb[16].mxu1 }
0x11b6   : > { %v2789_v9 = vpop.f32.mrb[17].mxu1 }
0x11b9   : > { %v1982_v11 = vpop.f32.mrb[12].mxu0 }
0x11ba   : > { %v2056_v12 = vadd.f32 %v2055_v8, %v1982_v11  ;;  %v2782_v14 = vpop.f32.mrb[13].mxu0 }
0x11bb   : > { %v2277_v14 = vld [vmem:[%s3642_s16 + $0x8] sm:$0xff] }
0x11bc   : > { %v2059_v16 = vadd.f32 %v2056_v12, %v3410_v28  ;;  %v2574_v28 = vld [vmem:[%s3636_s10 + $0x38] sm:$0xff]  ;;  %v2276_v12 = vld [vmem:[%s3642_s16] sm:$0xff] }
0x11bd   : > { %v2888_v29 = vpack.c.bf16 %v2574_v28, %v2573_v27  ;;  %v2355_v28 = vld [vmem:[%s3644_s18] sm:$0xff] }
0x11be   : > { %v2062_v17 = vadd.f32 %v2568_v15, %v2059_v16  ;;  %v2903_v15 = vpack.c.bf16 %v2277_v14, %v2276_v12  ;;  %v2278_v16 = vld [vmem:[%s3642_s16 + $0x10] sm:$0xff] }
0x11bf   : > { %2889 = vmatpush3.bf16.msra.mxu0 %v2888_v29  ;;  %v2356_v29 = vld [vmem:[%s3644_s18 + $0x8] sm:$0xff] }
0x11c0   : > { %v2068_v18 = vsel %vm2067_vm6, %v2062_v17, 0.0  ;;  %2902 = vmatprep.subr.bf16.mxu0 %v3061_v10 }
0x11c1   : > { %2069 = vadd.xlane.f32.xlu1 %v2068_v18 }
0x124e   : > { %v2070_v19 = vpop.xlane.xlu1 %2069 }
0x124f   : > { %v2071_v20 = vmul.f32 0.03125, %v2070_v19 }
0x1251   : > { %v2072_v21 = vsub.f32 %v2062_v17, %v2071_v20  ;;  %v2279_v17 = vld [vmem:[%s3642_s16 + $0x18] sm:$0xff] }
0x1252   : > { %v2906_v18 = vpack.c.bf16 %v2279_v17, %v2278_v16 }
0x1253   : > { %v2073_v22 = vmul.f32 %v2072_v21, %v2072_v21 }
0x1255   : > { %v2074_v24 = vsel %vm2067_vm6, %v2073_v22, 0.0 }
0x1256   : > { %2075 = vadd.xlane.f32.xlu0 %v2074_v24  ;;  %v2587_v24 = vld [vmem:[%s3640_s14 + $0x1] sm:$0x1] }
0x12e3   : > { %v2076_v30 = vpop.xlane.xlu0 %2075 }
0x12e4   : > { %v2077_v31 = vmul.f32 0.03125, %v2076_v30  ;;  %v2357_v30 = vld [vmem:[%s3644_s18 + $0x10] sm:$0xff] }
0x12e6   : > { %v2078_v32 = vadd.f32 1e-12, %v2077_v31  ;;  %v2909_v31 = vpack.c.bf16 %v2356_v29, %v2355_v28 }
0x12e8   : > { %2985 = vrsqrt.f32 %v2078_v32  ;;  %v2358_v32 = vld [vmem:[%s3644_s18 + $0x18] sm:$0xff] }
0x12f2   : > { %v2986_v34 = vpop.eup %2985 }
0x12f3   : > { %v2080_v36 = vmul.f32 %v2986_v34, %v2072_v21  ;;  %v2912_v34 = vpack.c.bf16 %v2358_v32, %v2357_v30 }
0x12f5   : > { %v2081_v38 = vmul.f32 %v2569_v35, %v2080_v36 }
0x12f7   : > { %v2082_v39 = vadd.f32 %v2570_v37, %v2081_v38 }
0x12f9   : > { %2799 = vmatmul.mubr.msk.f32.vlgmr.msra.gmra.mrb[14].mxu0 %vm642_vm0, %v2082_v39 }
0x12fa   : > { %2828 = vmatprep.mubr.msk.f32.mxu0 %vm3062_vm1, %v3063_v13  ;;  %2904 = vmatpush3.bf16.msra.mxu0 %v2903_v15 }
0x12fb   : > { %2905 = vmatprep.subr.bf16.mxu0 %v3061_v10 }
0x12fe   : > { %2907 = vmatpush3.bf16.msra.mxu0 %v2906_v18 }
0x12ff   : > { %2908 = vmatprep.subr.bf16.mxu0 %v3061_v10 }
0x13cc   : > { %v2159_v53 = vpop.f32.mrb[14].mxu0 }
0x13cd   : > { %v2160_v33 = vadd.f32 %v2575_v52, %v2159_v53  ;;  %v2800_v54 = vpop.f32.mrb[15].mxu0 }
0x13cf   : > { %v2164_v55 = vmul.f32 0.044715, %v2160_v33  ;;  %v2163_v61 = vmul.f32 0.5, %v2160_v33 }
0x13d1   : > { %v2165_v56 = vmul.f32 %v2164_v55, %v2160_v33 }
0x13d3   : > { %v2166_v57 = vmul.f32 %v2165_v56, %v2160_v33 }
0x13d5   : > { %v2167_v58 = vadd.f32 %v2166_v57, %v2160_v33 }
0x13d7   : > { %v2168_v59 = vmul.f32 0.7978846, %v2167_v58 }
0x13d9   : > { %2987 = vtanh.f32 %v2168_v59 }
0x13e3   : > { %v2988_v60 = vpop.eup %2987 }
0x13e4   : > { %v2170_v62 = vadd.f32 1.0, %v2988_v60 }
0x13e6   : > { %v2171_v63 = vmul.f32 %v2170_v62, %v2163_v61 }
0x13e8   : > { %2818 = vmatmul.mubr.msk.f32.vlgmr.msra.gmra.mrb[18].mxu1 %vm1388_vm4, %v2171_v63 }
0x14bb   : > { %v2252_v1 = vpop.f32.mrb[18].mxu1 }
0x14bc   : > { %v2253_v2 = vadd.f32 %v2585_v0, %v2252_v1  ;;  %v2819_v3 = vpop.f32.mrb[19].mxu1 }
0x14be   : > { %v2256_v4 = vadd.f32 %v2253_v2, %v2082_v39  ;;  %v2359_v39 = vld [vmem:[%s3645_s19] sm:$0x1] }
0x14c0   : > { %v2261_v5 = vsel %vm2067_vm6, %v2256_v4, 0.0 }
0x14c1   : > { %2262 = vadd.xlane.f32.xlu0 %v2261_v5 }
0x154e   : > { %v2263_v6 = vpop.xlane.xlu0 %2262 }
0x154f   : > { %v2264_v7 = vmul.f32 0.03125, %v2263_v6 }
0x1551   : > { %v2265_v8 = vsub.f32 %v2256_v4, %v2264_v7 }
0x1553   : > { %v2266_v9 = vmul.f32 %v2265_v8, %v2265_v8 }
0x1555   : > { %v2267_v11 = vsel %vm2067_vm6, %v2266_v9, 0.0 }
0x1556   : > { %2268 = vadd.xlane.f32.xlu1 %v2267_v11 }
0x15e3   : > { %v2269_v19 = vpop.xlane.xlu1 %2268 }
0x15e4   : > { %v2270_v20 = vmul.f32 0.03125, %v2269_v19 }
0x15e6   : > { %v2271_v21 = vadd.f32 1e-12, %v2270_v20 }
0x15e8   : > { %2989 = vrsqrt.f32 %v2271_v21 }
0x15f2   : > { %v2990_v22 = vpop.eup %2989 }
0x15f3   : > { %v2273_v25 = vmul.f32 %v2990_v22, %v2265_v8 }
0x15f5   : > { %v2274_v23 = vmul.f32 %v2587_v24, %v2273_v25 }
0x15f7   : > { %v2275_v27 = vadd.f32 %v2588_v26, %v2274_v23 }
0x15f9   : > { %2829 = vmatmul.mubr.msk.f32.vlgmr.msra.gmra.mrb[16].mxu0 %vm642_vm0, %v2275_v27 }
0x15fa   : > { %2839 = vmatprep.mubr.msk.f32.mxu0 %vm3062_vm1, %v3063_v13  ;;  %2910 = vmatpush3.bf16.msra.mxu0 %v2909_v31  ;;  %v2280_v13 = vld [vmem:[%s3643_s17] sm:$0x1] }
0x15fb   : > { %2911 = vmatprep.subr.bf16.mxu0 %v3061_v10 }
0x15fe   : > { %2913 = vmatpush3.bf16.msra.mxu0 %v2912_v34 }
0x16cc   : > { %v2350_v35 = vpop.f32.mrb[16].mxu0 }
0x16cd   : > { %v2351_v36 = vadd.f32 %v2350_v35, %v2280_v13  ;;  %v2830_v37 = vpop.f32.mrb[17].mxu0 }
0x16cf   : > { %2991 = vtanh.f32 %v2351_v36 }
0x16d9   : > { %v2992_v38 = vpop.eup %2991 }
0x16da   : > { %2840 = vmatmul.mubr.msk.f32.vlgmr.msra.gmra.mrb[18].mxu0 %vm642_vm0, %v2992_v38 }
0x17ad   : > { %v2429_v40 = vpop.f32.mrb[18].mxu0 }
0x17ae   : > { %v2430_v10 = vadd.f32 %v2429_v40, %v2359_v39  ;;  %v2841_v41 = vpop.f32.mrb[19].mxu0 }
0x17b0   : > { %v2434_v42 = vsel %vm2433_vm7, %v2430_v10, -inf }
0x17b1   : > { %2435 = vmax.xlane.f32.xlu0 %v2434_v42 }
0x183e   : > { %v2436_v43 = vpop.xlane.xlu0 %2435 }
0x183f   : > { %v2437_v44 = vsub.f32 %v2430_v10, %v2436_v43 }
0x1841   : > { %v2438_v45 = vmul.f32 1.442695, %v2437_v44 }
0x1843   : > { %2993 = vpow2.f32 %v2438_v45 }
0x184d   : > { %v2994_v46 = vpop.eup %2993 }
0x184e   : > { %v2440_v47 = vsel %vm2433_vm7, %v2994_v46, 0.0 }
0x184f   : > { %2441 = vadd.xlane.f32.xlu1 %v2440_v47 }
0x18dc   : > { %v2442_v48 = vpop.xlane.xlu1 %2441 }
0x18dd   : > { %2995 = vrcp.f32 %v2442_v48 }
0x18e7   : > { %v2996_v49 = vpop.eup %2995 }
0x18e8   : > { %v2444_v50 = vmul.f32 %v2996_v49, %v2994_v46 }
0x18ea   : > { %2445 = vst.msk [vmem:[%s630_s23] sm:$0x1] %vm2433_vm7, %v2444_v50 }
0x18eb   : > { %3010 = shalt.err (!%p3007_p3)
}
0x18ec   : > { %s3011_s1 = scalar_lea.hbm %s3583_s30, 16  ;;  %s3015_s0 = scalar_lea.hbm %s3646_s20, 32 }
0x18ed   : > { %p3012_p4 = scmp.ne.s32.totalorder %s3583_s30, %s3011_s1  ;;  %p3016_p9 = scmp.lt.u32.totalorder %s3583_s30, %s3646_s20 }
0x18ee   : > { %p3017_p10 = scmp.lt.u32.totalorder %s3015_s0, %s3011_s1  ;;  %p3019_p12 = scmp.lt.u32.totalorder %s3011_s1, %s3583_s30 }
0x18ef   : > { %p3013_p7 = pnand %p3012_p4, %p3213_p5 }
0x18f0   : > { %p3018_p11 = por %p3017_p10, %p3016_p9 }
0x18f1   : > { %p3014_p8 = pneg %p3013_p7 }
0x18f2   : > { %p3020_p13 = por %p3019_p12, %p3018_p11 }
0x18f4   : > { %p3021_p0 = pnand %p3020_p13, %p3014_p8 }
0x18f6   : > { %3024 = shalt.err (!%p3021_p0)
}
0x18f7   : > { %2914 = dma.vmem_to_hbm [thread:$0]  (%p3213_p5), %s3585_s27, 16, %s3583_s30, %s2447_s21  }
0x18f8 PF: > { %s3679_s3 = sld [smem:[#allocation5_spill]]  ;;  %p2920_p1 = scmp.ge.s32.totalorder %s3059_s24, 2 }
0x18fa   : > { %p2917_p2 = pnand %p2920_p1, %p3217_p6 }
0x18fe   : > { %s2471_s28 = sand.u32 1, %s3679_s3  }
0x18ff   : > { %s2472_s29 = scalar_lea.sflag [#allocation3], %s2471_s28 }
0x1900   : > { %3042 = dma.done.wait (!%p2917_p2), %s2472_s29, 16  }
0x1901   : > { %3044 = vsyncadd (!%p2917_p2), %s2472_s29, 4294967280  ;;  %s3681_s24 = sld [smem:[#allocation7_spill]]  ;;  %s3682_s23 = sld [smem:[#allocation6_spill]] }
0x1902   : > { %s3683_s0 = sld [smem:[#allocation8_spill]]  ;;  %s3684_s1 = smov %s3051_s22 }
0x1907   : > { %p30_p3 = scmp.ge.s32.totalorder %s3681_s24, 4   ;;  %s3685_s22 = smov %s3682_s23 }
0x1908   : > { %s3686_s23 = smov %s3683_s0 }
0x1909   :  { %32 = sbr.rel (!%p30_p3) target bundleno = 9 (0x9), region = 150 }
0x1910   :  { %2476 = vsyncpa [#allocation3], 1 }
0x1911   :  { %2478 = vsyncpa [#allocation3 + $0x1], 1 }

</bundles_post_ra>
